<compile_context>
chip_gen: v6e
topology: v6e:2x2x1
jax: 0.10.0
libtpu: 0.0.40
codegen_flags: <defaults>
</compile_context>

<pallas_src>
import functools

import jax
import jax.numpy as jnp
from jax.experimental import pallas as pl
from jax.experimental.pallas import tpu as pltpu

LANES = 128
SUBLANES = 8
ROW_MULT = 16                      # block-row multiple: covers f32 (8) and bf16/f16 (16) packing
NUM_PAR = 2                        # leading "parallel" grid axis (both TCs on v7x, harmless elsewhere)
BLOCK_BYTES = 2 * 1024 * 1024      # per input per buffer; 2 inputs x 2 buffers x 2 MiB = 8 MiB VMEM
VMEM_LIMIT_BYTES = 32 * 1024 * 1024
SMALL_N = 131072                   # below this a fused XLA reduce beats the kernel launch


def _partial_sum_kernel(p_ref, t_ref, out_ref, *, metric: str):
    """Accumulate per-core partial sums of |d| or d^2 into an (8,128) block."""
    i = pl.program_id(1)

    @pl.when(i == 0)
    def _():
        out_ref[...] = jnp.zeros((SUBLANES, LANES), jnp.float32)

    d = p_ref[...].astype(jnp.float32) - t_ref[...].astype(jnp.float32)
    if metric == "mae":
        c = jnp.abs(d)
    else:  # mse / rmse
        c = d * d

    # Fold the block's rows into the (8, 128) partial sum: the reshape only
    # re-indexes whole (8,128) sublane tiles and the axis-0 sum lowers to
    # streaming per-vreg VPU adds (no per-step XLU reduce).
    br = c.shape[0]
    out_ref[...] += jnp.sum(c.reshape(br // SUBLANES, SUBLANES, LANES), axis=0)


def _block_rows(per_core_rows: int, itemsize: int) -> int:
    """Byte-based block sizing: largest block <= BLOCK_BYTES that fits the data."""
    target = BLOCK_BYTES // (itemsize * LANES)
    target = max(ROW_MULT, (target // ROW_MULT) * ROW_MULT)
    avail = (per_core_rows // ROW_MULT) * ROW_MULT
    return min(target, avail)


def _metric_jnp(pred: jnp.ndarray, target: jnp.ndarray, metric: str) -> jnp.ndarray:
    d = pred.astype(jnp.float32) - target.astype(jnp.float32)
    if metric == "mae":
        return jnp.mean(jnp.abs(d))
    m = jnp.mean(d * d)
    return jnp.sqrt(m) if metric == "rmse" else m


def _tail_sum(tp: jnp.ndarray, tt: jnp.ndarray, metric: str) -> jnp.ndarray:
    d = tp.astype(jnp.float32) - tt.astype(jnp.float32)
    return jnp.sum(jnp.abs(d) if metric == "mae" else d * d)


def _launch(p2d, t2d, br, steps, metric):
    kernel = functools.partial(_partial_sum_kernel, metric=metric)
    partial = pl.pallas_call(
        kernel,
        out_shape=jax.ShapeDtypeStruct((NUM_PAR, SUBLANES, LANES), jnp.float32),
        grid_spec=pltpu.PrefetchScalarGridSpec(
            num_scalar_prefetch=0,
            grid=(NUM_PAR, steps),
            in_specs=[
                pl.BlockSpec((br, LANES), lambda c, i, s=steps: (c * s + i, 0)),
                pl.BlockSpec((br, LANES), lambda c, i, s=steps: (c * s + i, 0)),
            ],
            out_specs=pl.BlockSpec((None, SUBLANES, LANES), lambda c, i: (c, 0, 0)),
        ),
        compiler_params=pltpu.CompilerParams(
            dimension_semantics=("parallel", "arbitrary"),
            vmem_limit_bytes=VMEM_LIMIT_BYTES,
            # Let XLA fuse the (bitcast reshape / zero-pad) producers into the
            # kernel's inputs instead of materializing them in HBM.
            allow_input_fusion=[True, True],
        ),
    )(p2d, t2d)
    return jnp.sum(partial)


@functools.partial(jax.jit, static_argnames=("metric",))
def _metric_impl(pred: jnp.ndarray, target: jnp.ndarray, metric: str) -> jnp.ndarray:
    assert pred.shape == target.shape, "metric requires matching shapes"
    n = int(pred.size)
    if n == 0:
        return jnp.float32(jnp.nan)  # matches torch mean-of-empty behaviour
    if n < SMALL_N:
        return _metric_jnp(pred, target, metric)

    itemsize = max(pred.dtype.itemsize, target.dtype.itemsize)
    flat_p = pred.reshape(-1)   # bitcast, no copy
    flat_t = target.reshape(-1)

    total = None

    if n % LANES == 0:
        # ---- zero-copy path: (rows, 128) view of the original array --------
        rows = n // LANES
        br = _block_rows(rows // NUM_PAR, itemsize)
        if br < ROW_MULT:
            return _metric_jnp(pred, target, metric)
        steps = (rows // NUM_PAR) // br
        covered_rows = NUM_PAR * steps * br

        p2d = flat_p.reshape(rows, LANES)
        t2d = flat_t.reshape(rows, LANES)
        total = _launch(p2d, t2d, br, steps, metric)

        tail_len = n - covered_rows * LANES
        if tail_len > 0:
            # leftover rows: tiny fused jnp reduce (reads only the tail bytes)
            total = total + _tail_sum(flat_p[covered_rows * LANES:],
                                      flat_t[covered_rows * LANES:], metric)
    else:
        # ---- ragged path: zero-pad up to full block coverage ---------------
        # TODO(synk): without XLA input fusion this still materializes one
        # padded copy of each operand; a fully copy-free ragged path would
        # need 1-D block support or in-kernel element masking.
        rows = -(-n // LANES)
        per_core = -(-rows // NUM_PAR)
        per_core = -(-per_core // ROW_MULT) * ROW_MULT
        br = _block_rows(per_core, itemsize)
        if br < ROW_MULT:
            return _metric_jnp(pred, target, metric)
        steps = -(-per_core // br)
        covered_rows = NUM_PAR * steps * br
        pad = covered_rows * LANES - n

        p2d = jnp.pad(flat_p, (0, pad)).reshape(covered_rows, LANES)
        t2d = jnp.pad(flat_t, (0, pad)).reshape(covered_rows, LANES)
        total = _launch(p2d, t2d, br, steps, metric)

    mean = total / n
    if metric == "rmse":
        mean = jnp.sqrt(mean)
    return mean


# ---- JAX-side mirror of the PyTorch module glue ---------------------------


def _parse_metric(metric) -> str:
    if metric is None:
        return "rmse"
    if isinstance(metric, str):
        name = metric.lower()
        assert name in ("mae", "mse", "rmse")
        return name
    # TODO(synk): arbitrary user-supplied Metric callables are not translated;
    # only MAE / MSE / RMSE are supported in the Pallas path.
    raise ValueError(f"unsupported metric spec: {metric!r}")


class Loss:
    """JAX/Pallas equivalent of graph_pes.training.loss.Loss."""

    def __init__(self, property: str, metric="RMSE"):
        self.property = property
        self.metric = _parse_metric(metric)

    @property
    def name(self) -> str:
        return f"{self.property}_{self.metric}"

    def __call__(self, predictions: dict, graph_properties: dict) -> jnp.ndarray:
        return _metric_impl(
            predictions[self.property],
            graph_properties[self.property],
            metric=self.metric,
        )


if __name__ == "__main__":
    key = jax.random.PRNGKey(0)
    ks = jax.random.split(key, 6)

    # synthetic "AtomicGraph" style data:
    #   per-atom forces     (f32, 150_000 elems, not /128  -> ragged kernel path)
    #   per-structure energy (tiny                          -> jnp bypass)
    #   stress-like tensor  (bf16, 147_456 = 1152*128 elems -> zero-copy kernel path)
    predictions = {
        "forces": jax.random.normal(ks[0], (50_000, 3), jnp.float32),
        "energy": jax.random.normal(ks[2], (2,), jnp.float32),
        "stress": jax.random.normal(ks[4], (16_384, 3, 3), jnp.bfloat16),
    }
    graph_properties = {
        "forces": jax.random.normal(ks[1], (50_000, 3), jnp.float32),
        "energy": jax.random.normal(ks[3], (2,), jnp.float32),
        "stress": jax.random.normal(ks[5], (16_384, 3, 3), jnp.bfloat16),
    }

    losses = [
        Loss("forces", "RMSE"),
        Loss("forces", "MAE"),
        Loss("forces", "MSE"),
        Loss("energy", "RMSE"),
        Loss("stress", "RMSE"),
        Loss("stress", "MAE"),
    ]

    ok = True
    for loss in losses:
        val = loss(predictions, graph_properties)
        val = jax.block_until_ready(val)

        # pure-JAX reference (f32 math, matching the kernel's upcast)
        p = predictions[loss.property].astype(jnp.float32)
        t = graph_properties[loss.property].astype(jnp.float32)
        d = p - t
        if loss.metric == "mae":
            ref = jnp.mean(jnp.abs(d))
        elif loss.metric == "mse":
            ref = jnp.mean(d * d)
        else:
            ref = jnp.sqrt(jnp.mean(d * d))

        ok &= bool(jnp.allclose(val, ref, rtol=5e-4, atol=1e-6))

    if ok:
        print("KERNEL_OK")
    else:
        print("KERNEL_MISMATCH")
</pallas_src>

<mosaic_0001>
module attributes {stable_mosaic.version = 11 : i64} {
  func.func @_partial_sum_kernel(%arg0: i32, %arg1: i32, %arg2: memref<592x128xf32, #tpu.memory_space<vmem>>, %arg3: memref<592x128xf32, #tpu.memory_space<vmem>>, %arg4: memref<1x8x128xf32, #tpu.memory_space<vmem>>) attributes {dimension_semantics = [#tpu.dimension_semantics<parallel>, #tpu.dimension_semantics<arbitrary>], iteration_bounds = array<i64: 2, 1>, scalar_prefetch = 0 : i64, scratch_operands = 0 : i64, tpu.core_type = #tpu.core_type<tc>, window_params = [{transform_indices = @transform_0, window_bounds = array<i64: 592, 128>}, {transform_indices = @transform_1, window_bounds = array<i64: 592, 128>}, {transform_indices = @transform_2, window_bounds = array<i64: 1, 8, 128>}]} {
    %c0_i32 = arith.constant 0 : i32
    %0 = arith.cmpi eq, %arg1, %c0_i32 : i32
    %1 = arith.extui %0 : i1 to i32
    %c0_i32_0 = arith.constant 0 : i32
    %2 = arith.cmpi ne, %1, %c0_i32_0 : i32
    scf.if %2 {
      %cst_10 = arith.constant 0.000000e+00 : f32
      %15 = vector.broadcast %cst_10 : f32 to vector<8x128xf32>
      %c0_11 = arith.constant 0 : index
      %c0_12 = arith.constant 0 : index
      %c0_13 = arith.constant 0 : index
      %16 = vector.load %arg4[%c0_11, %c0_12, %c0_13] : memref<1x8x128xf32, #tpu.memory_space<vmem>>, vector<1x8x128xf32>
      %17 = vector.shape_cast %16 : vector<1x8x128xf32> to vector<8x128xf32>
      %18 = vector.shape_cast %15 : vector<8x128xf32> to vector<1x8x128xf32>
      tpu.vector_store %arg4[%c0_11, %c0_12, %c0_13], %18 {strides = array<i32>} : memref<1x8x128xf32, #tpu.memory_space<vmem>>, vector<1x8x128xf32>,
    } else {
    }
    %c0 = arith.constant 0 : index
    %c0_1 = arith.constant 0 : index
    %3 = vector.load %arg2[%c0, %c0_1] : memref<592x128xf32, #tpu.memory_space<vmem>>, vector<592x128xf32>
    %c0_2 = arith.constant 0 : index
    %c0_3 = arith.constant 0 : index
    %4 = vector.load %arg3[%c0_2, %c0_3] : memref<592x128xf32, #tpu.memory_space<vmem>>, vector<592x128xf32>
    %5 = arith.subf %3, %4 : vector<592x128xf32>
    %6 = arith.mulf %5, %5 : vector<592x128xf32>
    %c0_4 = arith.constant 0 : index
    %c0_5 = arith.constant 0 : index
    %c0_6 = arith.constant 0 : index
    %7 = vector.load %arg4[%c0_4, %c0_5, %c0_6] : memref<1x8x128xf32, #tpu.memory_space<vmem>>, vector<1x8x128xf32>
    %8 = vector.shape_cast %7 : vector<1x8x128xf32> to vector<8x128xf32>
    %9 = vector.shape_cast %6 : vector<592x128xf32> to vector<74x8x128xf32>
    %cst = arith.constant dense<0.000000e+00> : vector<8x128xf32>
    %10 = vector.multi_reduction <add>, %9, %cst [0] : vector<74x8x128xf32> to vector<8x128xf32>
    %11 = arith.addf %8, %10 : vector<8x128xf32>
    %c0_7 = arith.constant 0 : index
    %c0_8 = arith.constant 0 : index
    %c0_9 = arith.constant 0 : index
    %12 = vector.load %arg4[%c0_7, %c0_8, %c0_9] : memref<1x8x128xf32, #tpu.memory_space<vmem>>, vector<1x8x128xf32>
    %13 = vector.shape_cast %12 : vector<1x8x128xf32> to vector<8x128xf32>
    %14 = vector.shape_cast %11 : vector<8x128xf32> to vector<1x8x128xf32>
    tpu.vector_store %arg4[%c0_7, %c0_8, %c0_9], %14 {strides = array<i32>} : memref<1x8x128xf32, #tpu.memory_space<vmem>>, vector<1x8x128xf32>,
    return
  }
  func.func @transform_0(%arg0: i32, %arg1: i32) -> (i32, i32) {
    %c1_i32 = arith.constant 1 : i32
    %0 = arith.muli %arg0, %c1_i32 : i32
    %1 = arith.addi %0, %arg1 : i32
    %c0_i32 = arith.constant 0 : i32
    %c0_i32_0 = arith.constant 0 : i32
    return %1, %c0_i32 : i32, i32
  }
  func.func @transform_1(%arg0: i32, %arg1: i32) -> (i32, i32) {
    %c1_i32 = arith.constant 1 : i32
    %0 = arith.muli %arg0, %c1_i32 : i32
    %1 = arith.addi %0, %arg1 : i32
    %c0_i32 = arith.constant 0 : i32
    %c0_i32_0 = arith.constant 0 : i32
    return %1, %c0_i32 : i32, i32
  }
  func.func @transform_2(%arg0: i32, %arg1: i32) -> (i32, i32, i32) {
    %c0_i32 = arith.constant 0 : i32
    %c0_i32_0 = arith.constant 0 : i32
    %c0_i32_1 = arith.constant 0 : i32
    return %arg0, %c0_i32, %c0_i32_0 : i32, i32, i32
  }
}

</mosaic_0001>

<bundles_post_ra>
// kernel: _metric_impl.2
= control target key start
LH: loop header
LB: loop body
LE: loop exit
PB: predicated region body
PF: predicated region fallthrough
CT: control target
= control target key end

     0   :  { %s3457_s14 = smov 0   ;;  %s3459_s15 = smov 0   ;;  %s4664_s0 = inlined_call_operand.vmem [shape: f32[150000], index: 0, kind: input, shape index: {}]   ;;  %s4665_s1 = inlined_call_operand.<no memory space> [shape: f32[], index: 1, kind: input, shape index: {}]   ;;  %s4666_s2 = inlined_call_operand.vmem [shape: f32[150000], index: 2, kind: input, shape index: {}]   ;;  %s4667_s3 = inlined_call_operand.vmem [shape: f32[2,8,128], index: 3, kind: output, shape index: {}]  }
   0x1   :  { %v3455_v0 = vstv %s4665_s1  ;;  %s3461_s16 = smov 0  }
   0x2 LB: > { %s27_s1 = sadd.s32 1, %s3426_s15  ;;  %p2643_p0 = scmp.ge.s32.totalorder %s3430_s16, 1  ;;  %s3430_s16 = sphi %s3461_s16, %s15_s16   ;;  %s3426_s15 = sphi %s3459_s15, %s4846_s15   ;;  %s3422_s14 = sphi %s3457_s14, %s4845_s14  }
   0x3   : > { %p29_p1 = scmp.ge.s32.totalorder %s27_s1, 2  ;;  %p163_p2 = scmp.lt.s32.totalorder %s3430_s16, 3 }
   0x5   : > { %s4848_s1 = smov (%p29_p1, %s27_s1), 0  ;;  %p164_p3 = pnand %p2643_p0, %p163_p2 }
   0x7   : > { %167 = sbr.rel (%p164_p3) target bundleno = 251 (0xfb), region = 28 }
   0xc   : > { %s3478_s17 = smul.u32 74, %s3422_s14  ;;  %v4695_v1 = vlaneseq  ;;  %p231_p7 = scmp.lt.s32.totalorder %s3422_s14, 1 }
   0xd   : > { %s3485_s19 = smul.u32 75776, %s3422_s14 }
   0xe   : > { %p205_p4 = scmp.lt.s32.totalorder %s3478_s17, 146  ;;  %s1169_s28 = sadd.s32 72, %s3478_s17 }
   0xf   : > { %s3009_s20 = sadd.s32 33792, %s3485_s19  ;;  %s3011_s22 = sadd.s32 34816, %s3485_s19 }
  0x10   : > { %s3482_s18 = scalar_select %p205_p4, %s3478_s17, 146  ;;  %v666_v2 = vstv %s3009_s20  ;;  %v679_v5 = vstv %s3011_s22 }
  0x11   : > { %s3013_s23 = sadd.s32 35840, %s3485_s19  ;;  %s3015_s24 = sadd.s32 36864, %s3485_s19  ;;  %v3502_v4 = vadd.s32 %v666_v2, %v4695_v1  ;;  %v3508_v7 = vadd.s32 %v679_v5, %v4695_v1 }
  0x12   : > { %s2644_s21 = sshll.u32 %s3482_s18, 3  ;;  %s3017_s29 = sadd.s32 37888, %s3485_s19  ;;  %v692_v8 = vstv %s3013_s23  ;;  %v705_v9 = vstv %s3015_s24 }
  0x13   : > { %s3497_s27 = scalar_lea.vmem %s4666_s2, %s2644_s21  ;;  %s3019_s30 = sadd.s32 38912, %s3485_s19  ;;  %vm668_vm0 = vcmp.lt.s32.totalorder %v3502_v4, 150000  ;;  %v3514_v11 = vadd.s32 %v692_v8, %v4695_v1  ;;  %v3518_v13 = vadd.s32 %v705_v9, %v4695_v1  ;;  %vm681_vm1 = vcmp.lt.s32.totalorder %v3508_v7, 150000 }
  0x14   : > { %v2712_v3 = vld [vmem:[%s3497_s27 + $0x108] sm:$0xff]  ;;  %v2714_v6 = vld [vmem:[%s3497_s27 + $0x110] sm:$0xff]  ;;  %s3021_s4 = sadd.s32 39936, %s3485_s19  ;;  %v2716_v10 = vld [vmem:[%s3497_s27 + $0x118] sm:$0xff]  ;;  %s3023_s5 = sadd.s32 40960, %s3485_s19  ;;  %v718_v15 = vstv %s3017_s29 }
  0x15   : > { %v2718_v12 = vld [vmem:[%s3497_s27 + $0x120] sm:$0xff]  ;;  %s3025_s6 = sadd.s32 41984, %s3485_s19  ;;  %v3525_v14 = vsel %vm668_vm0, %v2712_v3, %v3455_v0  ;;  %v731_v16 = vstv %s3019_s30  ;;  %s3027_s7 = sadd.s32 43008, %s3485_s19  ;;  %v3534_v17 = vsel %vm681_vm1, %v2714_v6, %v3455_v0  ;;  %vm694_vm2 = vcmp.lt.s32.totalorder %v3514_v11, 150000  ;;  %v2720_v18 = vld [vmem:[%s3497_s27 + $0x128] sm:$0xff]  ;;  %v2722_v22 = vld [vmem:[%s3497_s27 + $0x130] sm:$0xff] }
  0x16   : > { %4701 = vst [vmem:[#allocation14_spill] sm:$0xff] %v3525_v14  ;;  %s3529_s8 = ssub.s32 146, %s1169_s28  ;;  %4702 = vst [vmem:[#allocation15_spill] sm:$0xff] %v3534_v17  ;;  %vm707_vm3 = vcmp.lt.s32.totalorder %v3518_v13, 150000  ;;  %v3540_v19 = vadd.s32 %v718_v15, %v4695_v1  ;;  %s3029_s9 = sadd.s32 44032, %s3485_s19  ;;  %v3547_v20 = vsel %vm694_vm2, %v2716_v10, %v3455_v0  ;;  %v3556_v23 = vadd.s32 %v731_v16, %v4695_v1  ;;  %v2724_v25 = vld [vmem:[%s3497_s27 + $0x138] sm:$0xff] }
  0x17   : > { %p1171_p5 = scmp.lt.s32.totalorder %s3529_s8, 0  ;;  %4703 = vst [vmem:[#allocation16_spill] sm:$0xff] %v3547_v20  ;;  %v3552_v21 = vsel %vm707_vm3, %v2718_v12, %v3455_v0  ;;  %v744_v24 = vstv %s3021_s4  ;;  %s3031_s10 = sadd.s32 45056, %s3485_s19  ;;  %v757_v27 = vstv %s3023_s5  ;;  %v770_v28 = vstv %s3025_s6  ;;  %v2726_v30 = vld [vmem:[%s3497_s27 + $0x140] sm:$0xff] }
  0x18   : > { %4704 = vst [vmem:[#allocation17_spill] sm:$0xff] %v3552_v21  ;;  %s1191_s11 = sadd.s32 73, %s3478_s17  ;;  %vm720_vm4 = vcmp.lt.s32.totalorder %v3540_v19, 150000  ;;  %v3563_v26 = vadd.s32 %v744_v24, %v4695_v1  ;;  %vm733_vm5 = vcmp.lt.s32.totalorder %v3556_v23, 150000  ;;  %v3575_v31 = vadd.s32 %v757_v27, %v4695_v1  ;;  %v2728_v32 = vld [vmem:[%s3497_s27 + $0x148] sm:$0xff]  ;;  %s3033_s13 = sadd.s32 46080, %s3485_s19 }
  0x19   : > { %s3565_s12 = scalar_select %p1171_p5, 0, 255  ;;  %v3570_v29 = vsel %vm720_vm4, %v2720_v18, %v3455_v0  ;;  %v3579_v33 = vadd.s32 %v770_v28, %v4695_v1  ;;  %v3587_v34 = vsel %vm733_vm5, %v2722_v22, %v3455_v0  ;;  %v783_v35 = vstv %s3027_s7  ;;  %v2730_v39 = vld [vmem:[%s3497_s27 + $0x150] sm:$0xff]  ;;  %v2732_v43 = vld [vmem:[%s3497_s27 + $0x158] sm:$0xff]  ;;  %v2734_v46 = vld [vmem:[%s3497_s27 + $0x160] sm:$0xff] }
  0x1a   : > { %4705 = vst [vmem:[#allocation18_spill] sm:$0xff] %v3570_v29  ;;  %s3582_s17 = ssub.s32 146, %s1191_s11  ;;  %4706 = vst [vmem:[#allocation19_spill] sm:$0xff] %v3587_v34  ;;  %vm746_vm6 = vcmp.lt.s32.totalorder %v3563_v26, 150000  ;;  %v796_v36 = vstv %s3029_s9  ;;  %s3035_s20 = sadd.s32 47104, %s3485_s19  ;;  %vm759_vm7 = vcmp.lt.s32.totalorder %v3575_v31, 150000  ;;  %v3607_v40 = vadd.s32 %v783_v35, %v4695_v1 }
  0x1b   : > { %v3595_v37 = vld [vmem:[%s3497_s27 + $0x240] sm:%s3565_s12]  ;;  %p1193_p6 = scmp.lt.s32.totalorder %s3582_s17, 0  ;;  %v3601_v38 = vsel %vm746_vm6, %v2724_v25, %v3455_v0  ;;  %vm772_vm8 = vcmp.lt.s32.totalorder %v3579_v33, 150000  ;;  %s3037_s22 = sadd.s32 48128, %s3485_s19  ;;  %v3614_v41 = vsel %vm759_vm7, %v2726_v30, %v3455_v0  ;;  %v3623_v44 = vadd.s32 %v796_v36, %v4695_v1  ;;  %v2736_v51 = vld [vmem:[%s3497_s27 + $0x168] sm:$0xff]  ;;  %v2738_v53 = vld [vmem:[%s3497_s27 + $0x170] sm:$0xff] }
  0x1c   : > { %4707 = vst [vmem:[#allocation20_spill] sm:$0xff] %v3601_v38  ;;  %s3039_s23 = sadd.s32 49152, %s3485_s19  ;;  %4708 = vst [vmem:[#allocation21_spill] sm:$0xff] %v3614_v41  ;;  %v3619_v42 = vsel %vm772_vm8, %v2728_v32, %v3455_v0  ;;  %v809_v45 = vstv %s3031_s10  ;;  %vm785_vm9 = vcmp.lt.s32.totalorder %v3607_v40, 150000  ;;  %v822_v48 = vstv %s3033_s13  ;;  %s3041_s25 = sadd.s32 50176, %s3485_s19  ;;  %v2740_v60 = vld [vmem:[%s3497_s27 + $0x178] sm:$0xff] }
  0x1d   : > { %4709 = vst [vmem:[#allocation22_spill] sm:$0xff] %v3619_v42  ;;  %s3627_s24 = scalar_select %p1193_p6, 0, 255  ;;  %v3632_v47 = vadd.s32 %v809_v45, %v4695_v1  ;;  %v835_v49 = vstv %s3035_s20  ;;  %v3637_v50 = vsel %vm785_vm9, %v2730_v39, %v3455_v0  ;;  %vm798_vm10 = vcmp.lt.s32.totalorder %v3623_v44, 150000  ;;  %v2742_v2 = vld [vmem:[%s3497_s27 + $0x180] sm:$0xff]  ;;  %v2744_v6 = vld [vmem:[%s3497_s27 + $0x188] sm:$0xff] }
  0x1e   : > { %4710 = vst [vmem:[#allocation23_spill] sm:$0xff] %v3637_v50  ;;  %v3642_v52 = vadd.s32 %v822_v48, %v4695_v1  ;;  %v3646_v54 = vadd.s32 %v835_v49, %v4695_v1  ;;  %v3656_v56 = vsel %vm798_vm10, %v2732_v43, %v3455_v0  ;;  %v848_v57 = vstv %s3037_s22  ;;  %s3043_s26 = sadd.s32 51200, %s3485_s19  ;;  %s3045_s28 = sadd.s32 52224, %s3485_s19  ;;  %v2746_v15 = vld [vmem:[%s3497_s27 + $0x190] sm:$0xff]  ;;  %v2748_v18 = vld [vmem:[%s3497_s27 + $0x198] sm:$0xff]  ;;  %v2750_v30 = vld [vmem:[%s3497_s27 + $0x1a0] sm:$0xff] }
  0x1f   : > { %v3651_v55 = vld [vmem:[%s3497_s27 + $0x248] sm:%s3627_s24]  ;;  %4711 = vst [vmem:[#allocation24_spill] sm:$0xff] %v3656_v56  ;;  %vm4691_vm11 = vcmp.lt.s32.totalorder %v3632_v47, 150000  ;;  %v861_v58 = vstv %s3039_s23  ;;  %v3670_v61 = vadd.s32 %v848_v57, %v4695_v1  ;;  %v874_v5 = vstv %s3041_s25  ;;  %s3047_s29 = sadd.s32 53248, %s3485_s19  ;;  %s3049_s30 = sadd.s32 54272, %s3485_s19 }
  0x20   : > { %v3664_v59 = vsel %vm4691_vm11, %v2734_v46, %v3455_v0  ;;  %vm4670_vm12 = vcmp.lt.s32.totalorder %v3642_v52, 150000  ;;  %vm4669_vm13 = vcmp.lt.s32.totalorder %v3646_v54, 150000  ;;  %v3684_v3 = vadd.s32 %v861_v58, %v4695_v1  ;;  %s3051_s4 = sadd.s32 55296, %s3485_s19  ;;  %s3053_s5 = sadd.s32 56320, %s3485_s19  ;;  %v2752_v39 = vld [vmem:[%s3497_s27 + $0x1a8] sm:$0xff]  ;;  %v2754_v46 = vld [vmem:[%s3497_s27 + $0x1b0] sm:$0xff] }
  0x21   : > { %4712 = vst [vmem:[#allocation25_spill] sm:$0xff] %v3664_v59  ;;  %v3675_v62 = vsel %vm4670_vm12, %v2736_v51, %v3455_v0  ;;  %v3680_v63 = vsel %vm4669_vm13, %v2738_v53, %v3455_v0  ;;  %vm4668_vm14 = vcmp.lt.s32.totalorder %v3670_v61, 150000  ;;  %v3691_v8 = vadd.s32 %v874_v5, %v4695_v1  ;;  %s3055_s6 = sadd.s32 57344, %s3485_s19  ;;  %s3057_s7 = sadd.s32 58368, %s3485_s19  ;;  %v2756_v57 = vld [vmem:[%s3497_s27 + $0x1b8] sm:$0xff] }
  0x22   : > { %4713 = vst [vmem:[#allocation26_spill] sm:$0xff] %v3675_v62  ;;  %4714 = vst [vmem:[#allocation27_spill] sm:$0xff] %v3680_v63  ;;  %v887_v9 = vstv %s3043_s26  ;;  %v900_v10 = vstv %s3045_s28  ;;  %v3696_v12 = vsel %vm4668_vm14, %v2740_v60, %v3455_v0  ;;  %vm4685_vm15 = vcmp.lt.s32.totalorder %v3684_v3, 150000  ;;  %s3059_s9 = sadd.s32 59392, %s3485_s19  ;;  %v2758_v60 = vld [vmem:[%s3497_s27 + $0x1c0] sm:$0xff]  ;;  %s3061_s10 = sadd.s32 60416, %s3485_s19 }
  0x23   : > { %4715 = vst [vmem:[#allocation28_spill] sm:$0xff] %v3696_v12  ;;  %v3701_v16 = vadd.s32 %v887_v9, %v4695_v1  ;;  %v3705_v22 = vadd.s32 %v900_v10, %v4695_v1  ;;  %v3711_v24 = vsel %vm4685_vm15, %v2742_v2, %v3455_v0  ;;  %vm4671_vm14 = vcmp.lt.s32.totalorder %v3691_v8, 150000  ;;  %s3063_s11 = sadd.s32 61440, %s3485_s19  ;;  %s3065_s13 = sadd.s32 62464, %s3485_s19  ;;  %v2788_v59 = vld [vmem:[%s3497_s27 + $0x238] sm:$0xff] }
  0x24   : > { %4716 = vst [vmem:[#allocation29_spill] sm:$0xff] %v3711_v24  ;;  %v913_v25 = vstv %s3047_s29  ;;  %v926_v27 = vstv %s3049_s30  ;;  %v3719_v28 = vsel %vm4671_vm14, %v2744_v6, %v3455_v0  ;;  %v939_v45 = vstv %s3051_s4  ;;  %s3067_s20 = sadd.s32 63488, %s3485_s19  ;;  %s3069_s22 = sadd.s32 64512, %s3485_s19 }
  0x25   : > { %4717 = vst [vmem:[#allocation30_spill] sm:$0xff] %v3719_v28  ;;  %vm4674_vm13 = vcmp.lt.s32.totalorder %v3701_v16, 150000  ;;  %vm4672_vm12 = vcmp.lt.s32.totalorder %v3705_v22, 150000  ;;  %v3725_v32 = vadd.s32 %v913_v25, %v4695_v1  ;;  %v3739_v43 = vadd.s32 %v926_v27, %v4695_v1  ;;  %s3808_s26 = scalar_lea.vmem %s4664_s0, %s2644_s21  ;;  %s3071_s18 = sadd.s32 65536, %s3485_s19  ;;  %v2778_v28 = vld [vmem:[%s3497_s27 + $0x210] sm:$0xff] }
  0x26   : > { %v3730_v35 = vsel %vm4674_vm13, %v2746_v15, %v3455_v0  ;;  %v3735_v36 = vsel %vm4672_vm12, %v2748_v18, %v3455_v0  ;;  %v3746_v48 = vadd.s32 %v939_v45, %v4695_v1  ;;  %v952_v49 = vstv %s3053_s5  ;;  %v2760_v15 = vld [vmem:[%s3497_s27 + $0x1c8] sm:$0xff]  ;;  %s3073_s21 = sadd.s32 66560, %s3485_s19  ;;  %s3075_s28 = sadd.s32 67584, %s3485_s19  ;;  %v2869_v50 = vld [vmem:[%s3808_s26 + $0x130] sm:$0xff]  ;;  %v2873_v42 = vld [vmem:[%s3808_s26 + $0x140] sm:$0xff] }
  0x27   : > { %4718 = vst [vmem:[#allocation31_spill] sm:$0xff] %v3730_v35  ;;  %4719 = vst [vmem:[#allocation32_spill] sm:$0xff] %v3735_v36  ;;  %vm4673_vm14 = vcmp.lt.s32.totalorder %v3725_v32, 150000  ;;  %v965_v51 = vstv %s3055_s6  ;;  %vm4675_vm12 = vcmp.lt.s32.totalorder %v3739_v43, 150000  ;;  %v3756_v58 = vadd.s32 %v952_v49, %v4695_v1  ;;  %v2774_v36 = vld [vmem:[%s3497_s27 + $0x200] sm:$0xff]  ;;  %s3081_s29 = sadd.s32 70656, %s3485_s19 }
  0x28   : > { %v3751_v53 = vsel %vm4673_vm14, %v2750_v30, %v3455_v0  ;;  %v3760_v2 = vadd.s32 %v965_v51, %v4695_v1  ;;  %v3766_v5 = vsel %vm4675_vm12, %v2752_v39, %v3455_v0  ;;  %vm4676_vm14 = vcmp.lt.s32.totalorder %v3746_v48, 150000  ;;  %v2762_v30 = vld [vmem:[%s3497_s27 + $0x1d0] sm:$0xff]  ;;  %s3083_s30 = sadd.s32 71680, %s3485_s19  ;;  %s3085_s4 = sadd.s32 72704, %s3485_s19  ;;  %v2875_v41 = vld [vmem:[%s3808_s26 + $0x148] sm:$0xff]  ;;  %v2879_v34 = vld [vmem:[%s3808_s26 + $0x158] sm:$0xff] }
  0x29   : > { %4720 = vst [vmem:[#allocation33_spill] sm:$0xff] %v3751_v53  ;;  %4721 = vst [vmem:[#allocation34_spill] sm:$0xff] %v3766_v5  ;;  %v978_v6 = vstv %s3057_s7  ;;  %v991_v9 = vstv %s3059_s9  ;;  %v3774_v10 = vsel %vm4676_vm14, %v2754_v46, %v3455_v0  ;;  %vm4679_vm13 = vcmp.lt.s32.totalorder %v3756_v58, 150000  ;;  %v2764_v46 = vld [vmem:[%s3497_s27 + $0x1d8] sm:$0xff]  ;;  %s3087_s5 = sadd.s32 73728, %s3485_s19  ;;  %s3089_s6 = sadd.s32 74752, %s3485_s19 }
  0x2a   : > { %4722 = vst [vmem:[#allocation35_spill] sm:$0xff] %v3774_v10  ;;  %vm4677_vm12 = vcmp.lt.s32.totalorder %v3760_v2, 150000  ;;  %v3780_v18 = vadd.s32 %v978_v6, %v4695_v1  ;;  %v3785_v25 = vsel %vm4679_vm13, %v2756_v57, %v3455_v0  ;;  %v3794_v39 = vadd.s32 %v991_v9, %v4695_v1  ;;  %v2766_v6 = vld [vmem:[%s3497_s27 + $0x1e0] sm:$0xff]  ;;  %v3850_v10 = vld [vmem:[%s3808_s26 + $0x248] sm:%s3627_s24]  ;;  %s3079_s24 = sadd.s32 69632, %s3485_s19  ;;  %v2877_v38 = vld [vmem:[%s3808_s26 + $0x150] sm:$0xff] }
  0x2b   : > { %4723 = vst [vmem:[#allocation36_spill] sm:$0xff] %v3785_v25  ;;  %v3790_v27 = vsel %vm4677_vm12, %v2758_v60, %v3455_v0  ;;  %v1004_v45 = vstv %s3061_s10  ;;  %v1017_v51 = vstv %s3063_s11  ;;  %v1030_v57 = vstv %s3065_s13  ;;  %4728 = vst [vmem:[#allocation41_spill] sm:$0xff] %v3850_v10  ;;  %v2881_v29 = vld [vmem:[%s3808_s26 + $0x160] sm:$0xff]  ;;  %s2949_s7 = sadd.s32 3072, %s3485_s19  ;;  %s2951_s9 = sadd.s32 4096, %s3485_s19 }
  0x2c   : > { %4724 = vst [vmem:[#allocation37_spill] sm:$0xff] %v3790_v27  ;;  %vm4678_vm14 = vcmp.lt.s32.totalorder %v3780_v18, 150000  ;;  %v3801_v49 = vadd.s32 %v1004_v45, %v4695_v1  ;;  %vm4680_vm12 = vcmp.lt.s32.totalorder %v3794_v39, 150000  ;;  %v3818_v9 = vadd.s32 %v1017_v51, %v4695_v1  ;;  %v2768_v45 = vld [vmem:[%s3497_s27 + $0x1e8] sm:$0xff]  ;;  %v2887_v21 = vld [vmem:[%s3808_s26 + $0x178] sm:$0xff]  ;;  %v2889_v20 = vld [vmem:[%s3808_s26 + $0x180] sm:$0xff] }
  0x2d   : > { %v3813_v60 = vsel %vm4678_vm14, %v2760_v15, %v3455_v0  ;;  %v3822_v27 = vadd.s32 %v1030_v57, %v4695_v1  ;;  %v3828_v15 = vsel %vm4680_vm12, %v2762_v30, %v3455_v0  ;;  %v1043_v25 = vstv %s3067_s20  ;;  %v2891_v17 = vld [vmem:[%s3808_s26 + $0x188] sm:$0xff]  ;;  %v2897_v10 = vld [vmem:[%s3808_s26 + $0x1a0] sm:$0xff]  ;;  %v2911_v40 = vld [vmem:[%s3808_s26 + $0x1d8] sm:$0xff]  ;;  %s2953_s10 = sadd.s32 5120, %s3485_s19  ;;  %s2955_s11 = sadd.s32 6144, %s3485_s19 }
  0x2e   : > { %4725 = vst [vmem:[#allocation38_spill] sm:$0xff] %v3813_v60  ;;  %4726 = vst [vmem:[#allocation39_spill] sm:$0xff] %v3828_v15  ;;  %vm4681_vm14 = vcmp.lt.s32.totalorder %v3801_v49, 150000  ;;  %v2770_v60 = vld [vmem:[%s3497_s27 + $0x1f0] sm:$0xff]  ;;  %v1056_v51 = vstv %s3069_s22  ;;  %vm4684_vm13 = vcmp.lt.s32.totalorder %v3818_v9, 150000  ;;  %v3842_v30 = vadd.s32 %v1043_v25, %v4695_v1  ;;  %v3846_v15 = vld [vmem:[%s3808_s26 + $0x240] sm:%s3565_s12] }
  0x2f   : > { %v3837_v57 = vsel %vm4681_vm14, %v2764_v46, %v3455_v0  ;;  %vm4682_vm12 = vcmp.lt.s32.totalorder %v3822_v27, 150000  ;;  %v3855_v5 = vsel %vm4684_vm13, %v2766_v6, %v3455_v0  ;;  %v3864_v25 = vadd.s32 %v1056_v51, %v4695_v1  ;;  %s3077_s12 = sadd.s32 68608, %s3485_s19  ;;  %v2776_v51 = vld [vmem:[%s3497_s27 + $0x208] sm:$0xff]  ;;  %s2957_s13 = sadd.s32 7168, %s3485_s19 }
  0x30   : > { %4727 = vst [vmem:[#allocation40_spill] sm:$0xff] %v3837_v57  ;;  %4729 = vst [vmem:[#allocation42_spill] sm:$0xff] %v3855_v5  ;;  %v3860_v46 = vsel %vm4682_vm12, %v2768_v45, %v3455_v0  ;;  %v2772_v57 = vld [vmem:[%s3497_s27 + $0x1f8] sm:$0xff]  ;;  %v1069_v53 = vstv %s3071_s18  ;;  %vm4683_vm14 = vcmp.lt.s32.totalorder %v3842_v30, 150000  ;;  %v1082_v5 = vstv %s3073_s21  ;;  %v2899_v11 = vld [vmem:[%s3808_s26 + $0x1a8] sm:$0xff]  ;;  %s2959_s20 = sadd.s32 8192, %s3485_s19 }
  0x31   : > { %4730 = vst [vmem:[#allocation43_spill] sm:$0xff] %v3860_v46  ;;  %v3871_v6 = vadd.s32 %v1069_v53, %v4695_v1  ;;  %v1095_v35 = vstv %s3075_s28  ;;  %v3876_v45 = vsel %vm4683_vm14, %v2770_v60, %v3455_v0  ;;  %vm4690_vm12 = vcmp.lt.s32.totalorder %v3864_v25, 150000  ;;  %s2961_s22 = sadd.s32 9216, %s3485_s19  ;;  %s2963_s23 = sadd.s32 10240, %s3485_s19 }
  0x32   : > { %4731 = vst [vmem:[#allocation44_spill] sm:$0xff] %v3876_v45  ;;  %v3881_v46 = vadd.s32 %v1082_v5, %v4695_v1  ;;  %v3885_v24 = vadd.s32 %v1095_v35, %v4695_v1  ;;  %v3891_v53 = vsel %vm4690_vm12, %v2772_v57, %v3455_v0  ;;  %v1108_v60 = vstv %s3077_s12  ;;  %v2780_v35 = vld [vmem:[%s3497_s27 + $0x218] sm:$0xff]  ;;  %s2965_s25 = sadd.s32 11264, %s3485_s19  ;;  %s2967_s18 = sadd.s32 12288, %s3485_s19 }
  0x33   : > { %4732 = vst [vmem:[#allocation45_spill] sm:$0xff] %v3891_v53  ;;  %vm4686_vm14 = vcmp.lt.s32.totalorder %v3871_v6, 150000  ;;  %v1121_v45 = vstv %s3079_s24  ;;  %v3905_v57 = vadd.s32 %v1108_v60, %v4695_v1  ;;  %v1134_v63 = vstv %s3081_s29  ;;  %v2784_v60 = vld [vmem:[%s3497_s27 + $0x228] sm:$0xff]  ;;  %s2969_s21 = sadd.s32 13312, %s3485_s19  ;;  %s2971_s28 = sadd.s32 14336, %s3485_s19 }
  0x34   : > { %v3899_v5 = vsel %vm4686_vm14, %v2774_v36, %v3455_v0  ;;  %vm4688_vm13 = vcmp.lt.s32.totalorder %v3881_v46, 150000  ;;  %vm4687_vm15 = vcmp.lt.s32.totalorder %v3885_v24, 150000  ;;  %v3919_v12 = vadd.s32 %v1121_v45, %v4695_v1  ;;  %v2786_v45 = vld [vmem:[%s3497_s27 + $0x230] sm:$0xff]  ;;  %s2973_s12 = sadd.s32 15360, %s3485_s19  ;;  %s2975_s24 = sadd.s32 16384, %s3485_s19 }
  0x35   : > { %4733 = vst [vmem:[#allocation46_spill] sm:$0xff] %v3899_v5  ;;  %v3910_v53 = vsel %vm4688_vm13, %v2776_v51, %v3455_v0  ;;  %v3915_v36 = vsel %vm4687_vm15, %v2778_v28, %v3455_v0  ;;  %v2782_v5 = vld [vmem:[%s3497_s27 + $0x220] sm:$0xff]  ;;  %vm4689_vm14 = vcmp.lt.s32.totalorder %v3905_v57, 150000  ;;  %v3925_v62 = vadd.s32 %v1134_v63, %v4695_v1  ;;  %s2977_s29 = sadd.s32 17408, %s3485_s19  ;;  %s4850_s14 = smov (!%p231_p7, %s3422_s14), 1 }
  0x36   : > { %4734 = vst [vmem:[#allocation47_spill] sm:$0xff] %v3910_v53  ;;  %4735 = vst [vmem:[#allocation48_spill] sm:$0xff] %v3915_v36  ;;  %v1147_v51 = vstv %s3083_s30  ;;  %v1160_v53 = vstv %s3085_s4  ;;  %v3930_v28 = vsel %vm4689_vm14, %v2780_v35, %v3455_v0  ;;  %vm1123_vm15 = vcmp.lt.s32.totalorder %v3919_v12, 150000  ;;  %v4795_v12 = vld [vmem:[#allocation24_spill] sm:$0xff]  ;;  %s2979_s30 = sadd.s32 18432, %s3485_s19  ;;  %s2981_s4 = sadd.s32 19456, %s3485_s19 }
  0x37   : > { %4736 = vst [vmem:[#allocation49_spill] sm:$0xff] %v3930_v28  ;;  %v3935_v36 = vadd.s32 %v1147_v51, %v4695_v1  ;;  %v3939_v56 = vadd.s32 %v1160_v53, %v4695_v1  ;;  %v3944_v63 = vsel %vm1123_vm15, %v2782_v5, %v3455_v0  ;;  %vm4694_vm13 = vcmp.lt.s32.totalorder %v3925_v62, 150000 }
  0x38   : > { %4737 = vst [vmem:[#allocation50_spill] sm:$0xff] %v3944_v63  ;;  %v1176_v35 = vstv %s3529_s8  ;;  %v1182_v28 = vstv %s3087_s5  ;;  %v3952_v51 = vsel %vm4694_vm13, %v2784_v60, %v3455_v0  ;;  %v4739_v53 = vmov 0  ;;  %s2945_s8 = sadd.s32 1024, %s3485_s19  ;;  %s2983_s5 = sadd.s32 20480, %s3485_s19 }
  0x39   : > { %4738 = vst [vmem:[#allocation51_spill] sm:$0xff] %v3952_v51  ;;  %vm4692_vm14 = vcmp.lt.s32.totalorder %v3935_v36, 150000  ;;  %vm4693_vm12 = vcmp.lt.s32.totalorder %v3939_v56, 150000  ;;  %vm3956_vm11 = vcmp.lt.s32.totalorder %v1176_v35, 0  ;;  %v3975_v51 = vadd.s32 %v1182_v28, %v4695_v1 }
  0x3a   : > { %v4740_v53 = vsel %vm3956_vm11, 4294967295, %v4739_v53  ;;  %v3963_v5 = vsel %vm4692_vm14, %v2786_v45, %v3455_v0  ;;  %v3968_v60 = vsel %vm4693_vm12, %v2788_v59, %v3455_v0  ;;  %v1178_v35 = vsel %vm3956_vm11, %v3455_v0, %v3595_v37 }
  0x3b   : > { %4741 = vst [vmem:[#allocation52_spill] sm:$0xff] %v4740_v53  ;;  %4742 = vst [vmem:[#allocation53_spill] sm:$0xff] %v3963_v5  ;;  %v1198_v63 = vstv %s3582_s17  ;;  %v1204_v45 = vstv %s3089_s6  ;;  %vm1184_vm14 = vcmp.lt.s32.totalorder %v3975_v51, 150000  ;;  %v4745_v59 = vmov 0  ;;  %v2867_v5 = vld [vmem:[%s3808_s26 + $0x128] sm:$0xff]  ;;  %s2947_s17 = sadd.s32 2048, %s3485_s19 }
  0x3c   : > { %4743 = vst [vmem:[#allocation54_spill] sm:$0xff] %v3968_v60  ;;  %4744 = vst [vmem:[#allocation55_spill] sm:$0xff] %v3975_v51  ;;  %vm3979_vm12 = vcmp.lt.s32.totalorder %v1198_v63, 0  ;;  %v3984_v60 = vadd.s32 %v1204_v45, %v4695_v1  ;;  %v3989_v37 = vsel %vm1184_vm14, %v1178_v35, %v3455_v0  ;;  %v2859_v45 = vld [vmem:[%s3808_s26 + $0x108] sm:$0xff]  ;;  %v2861_v35 = vld [vmem:[%s3808_s26 + $0x110] sm:$0xff]  ;;  %v4044_v7 = vsel %vm720_vm4, %v2867_v5, %v3455_v0  ;;  %s2985_s6 = sadd.s32 21504, %s3485_s19 }
  0x3d   : > { %v4746_v59 = vsel %vm3979_vm12, 4294967295, %v4745_v59  ;;  %4749 = vst [vmem:[#allocation58_spill] sm:$0xff] %v3989_v37  ;;  %v1200_v28 = vsel %vm3979_vm12, %v3455_v0, %v3651_v55  ;;  %v2863_v1 = vld [vmem:[%s3808_s26 + $0x118] sm:$0xff]  ;;  %v2865_v37 = vld [vmem:[%s3808_s26 + $0x120] sm:$0xff]  ;;  %v4021_v14 = vsel %vm668_vm0, %v2859_v45, %v3455_v0  ;;  %v2893_v51 = vld [vmem:[%s3808_s26 + $0x190] sm:$0xff]  ;;  %v4049_v45 = vsel %vm733_vm5, %v2869_v50, %v3455_v0 }
  0x3e   : > { %4747 = vst [vmem:[#allocation56_spill] sm:$0xff] %v4746_v59  ;;  %4748 = vst [vmem:[#allocation57_spill] sm:$0xff] %v3984_v60  ;;  %vm1206_vm13 = vcmp.lt.s32.totalorder %v3984_v60, 150000  ;;  %v2871_v55 = vld [vmem:[%s3808_s26 + $0x138] sm:$0xff]  ;;  %v4026_v60 = vsel %vm681_vm1, %v2861_v35, %v3455_v0  ;;  %v4034_v53 = vsel %vm694_vm2, %v2863_v1, %v3455_v0  ;;  %v4039_v4 = vsel %vm707_vm3, %v2865_v37, %v3455_v0  ;;  %v2901_v1 = vld [vmem:[%s3808_s26 + $0x1b0] sm:$0xff] }
  0x3f   : > { %v3999_v63 = vsel %vm1206_vm13, %v1200_v28, %v3455_v0  ;;  %v2883_v28 = vld [vmem:[%s3808_s26 + $0x168] sm:$0xff]  ;;  %v2895_v59 = vld [vmem:[%s3808_s26 + $0x198] sm:$0xff]  ;;  %4751 = vst [vmem:[#allocation60_spill] sm:$0xff] %v4049_v45  ;;  %v1724_v13 = vsel %vm746_vm6, %v2871_v55, %v3455_v0  ;;  %v1737_v19 = vsel %vm759_vm7, %v2873_v42, %v3455_v0  ;;  %v1750_v23 = vsel %vm772_vm8, %v2875_v41, %v3455_v0  ;;  %v2905_v5 = vld [vmem:[%s3808_s26 + $0x1c0] sm:$0xff] }
  0x40   : > { %4750 = vst [vmem:[#allocation59_spill] sm:$0xff] %v3999_v63  ;;  %v2885_v63 = vld [vmem:[%s3808_s26 + $0x170] sm:$0xff]  ;;  %v2903_v35 = vld [vmem:[%s3808_s26 + $0x1b8] sm:$0xff]  ;;  %v1763_v50 = vsel %vm785_vm9, %v2877_v38, %v3455_v0  ;;  %v2907_v37 = vld [vmem:[%s3808_s26 + $0x1c8] sm:$0xff]  ;;  %v1776_v26 = vsel %vm798_vm10, %v2879_v34, %v3455_v0  ;;  %vm4752_vm0 = vcmp.lt.s32.totalorder %v3632_v47, 150000  ;;  %vm4753_vm1 = vcmp.lt.s32.totalorder %v3642_v52, 150000 }
  0x41   : > { %v2909_v45 = vld [vmem:[%s3808_s26 + $0x1d0] sm:$0xff]  ;;  %v1789_v31 = vsel %vm4752_vm0, %v2881_v29, %v3455_v0  ;;  %v1802_v33 = vsel %vm4753_vm1, %v2883_v28, %v3455_v0  ;;  %vm4754_vm2 = vcmp.lt.s32.totalorder %v3646_v54, 150000  ;;  %v2913_v41 = vld [vmem:[%s3808_s26 + $0x1e0] sm:$0xff]  ;;  %v2915_v42 = vld [vmem:[%s3808_s26 + $0x1e8] sm:$0xff]  ;;  %vm4755_vm3 = vcmp.lt.s32.totalorder %v3670_v61, 150000 }
  0x42   : > { %v1815_v38 = vsel %vm4754_vm2, %v2885_v63, %v3455_v0  ;;  %v1828_v34 = vsel %vm4755_vm3, %v2887_v21, %v3455_v0  ;;  %vm4756_vm4 = vcmp.lt.s32.totalorder %v3684_v3, 150000  ;;  %vm4757_vm5 = vcmp.lt.s32.totalorder %v3691_v8, 150000  ;;  %v2917_v52 = vld [vmem:[%s3808_s26 + $0x1f0] sm:$0xff]  ;;  %v2919_v54 = vld [vmem:[%s3808_s26 + $0x1f8] sm:$0xff]  ;;  %v2921_v63 = vld [vmem:[%s3808_s26 + $0x200] sm:$0xff] }
  0x43   : > { %v1841_v29 = vsel %vm4756_vm4, %v2889_v20, %v3455_v0  ;;  %v1854_v44 = vsel %vm4757_vm5, %v2891_v17, %v3455_v0  ;;  %vm4758_vm6 = vcmp.lt.s32.totalorder %v3701_v16, 150000  ;;  %vm4759_vm7 = vcmp.lt.s32.totalorder %v3705_v22, 150000  ;;  %v2923_v3 = vld [vmem:[%s3808_s26 + $0x208] sm:$0xff]  ;;  %v2925_v8 = vld [vmem:[%s3808_s26 + $0x210] sm:$0xff]  ;;  %v2927_v16 = vld [vmem:[%s3808_s26 + $0x218] sm:$0xff] }
  0x44   : > { %v1867_v47 = vsel %vm4758_vm6, %v2893_v51, %v3455_v0  ;;  %v1880_v21 = vsel %vm4759_vm7, %v2895_v59, %v3455_v0  ;;  %vm4760_vm8 = vcmp.lt.s32.totalorder %v3725_v32, 150000  ;;  %vm4761_vm9 = vcmp.lt.s32.totalorder %v3739_v43, 150000  ;;  %v2931_v51 = vld [vmem:[%s3808_s26 + $0x228] sm:$0xff]  ;;  %v2933_v59 = vld [vmem:[%s3808_s26 + $0x230] sm:$0xff]  ;;  %v2935_v55 = vld [vmem:[%s3808_s26 + $0x238] sm:$0xff] }
  0x45   : > { %v1893_v20 = vsel %vm4760_vm8, %v2897_v10, %v3455_v0  ;;  %v1906_v17 = vsel %vm4761_vm9, %v2899_v11, %v3455_v0  ;;  %vm4762_vm10 = vcmp.lt.s32.totalorder %v3746_v48, 150000  ;;  %vm4763_vm0 = vcmp.lt.s32.totalorder %v3756_v58, 150000  ;;  %v2929_v10 = vld [vmem:[%s3808_s26 + $0x220] sm:$0xff]  ;;  %v4780_v11 = vld [vmem:[#allocation41_spill] sm:$0xff] }
  0x46   : > { %v1919_v61 = vsel %vm4762_vm10, %v2901_v1, %v3455_v0  ;;  %v1932_v22 = vsel %vm4763_vm0, %v2903_v35, %v3455_v0  ;;  %vm4764_vm1 = vcmp.lt.s32.totalorder %v3760_v2, 150000  ;;  %vm4765_vm2 = vcmp.lt.s32.totalorder %v3780_v18, 150000 }
  0x47   : > { %v1945_v32 = vsel %vm4764_vm1, %v2905_v5, %v3455_v0  ;;  %v1958_v43 = vsel %vm4765_vm2, %v2907_v37, %v3455_v0  ;;  %vm4766_vm3 = vcmp.lt.s32.totalorder %v3794_v39, 150000  ;;  %vm4767_vm4 = vcmp.lt.s32.totalorder %v3801_v49, 150000 }
  0x48   : > { %v1971_v48 = vsel %vm4766_vm3, %v2909_v45, %v3455_v0  ;;  %v1984_v58 = vsel %vm4767_vm4, %v2911_v40, %v3455_v0  ;;  %vm4768_vm5 = vcmp.lt.s32.totalorder %v3818_v9, 150000  ;;  %vm4769_vm6 = vcmp.lt.s32.totalorder %v3822_v27, 150000  ;;  %v4784_v40 = vld [vmem:[#allocation14_spill] sm:$0xff] }
  0x49   : > { %v1997_v2 = vsel %vm4768_vm5, %v2913_v41, %v3455_v0  ;;  %v2010_v18 = vsel %vm4769_vm6, %v2915_v42, %v3455_v0  ;;  %vm4770_vm7 = vcmp.lt.s32.totalorder %v3842_v30, 150000  ;;  %vm4771_vm8 = vcmp.lt.s32.totalorder %v3864_v25, 150000 }
  0x4a   : > { %v2023_v39 = vsel %vm4770_vm7, %v2917_v52, %v3455_v0  ;;  %v2036_v49 = vsel %vm4771_vm8, %v2919_v54, %v3455_v0  ;;  %vm4772_vm9 = vcmp.lt.s32.totalorder %v3871_v6, 150000  ;;  %vm4773_vm10 = vcmp.lt.s32.totalorder %v3881_v46, 150000  ;;  %v4786_v52 = vld [vmem:[#allocation16_spill] sm:$0xff] }
  0x4b   : > { %v2049_v9 = vsel %vm4772_vm9, %v2921_v63, %v3455_v0  ;;  %v2062_v27 = vsel %vm4773_vm10, %v2923_v3, %v3455_v0  ;;  %vm4774_vm0 = vcmp.lt.s32.totalorder %v3885_v24, 150000  ;;  %vm4775_vm1 = vcmp.lt.s32.totalorder %v3905_v57, 150000  ;;  %v4787_v63 = vld [vmem:[#allocation17_spill] sm:$0xff] }
  0x4c   : > { %v2075_v30 = vsel %vm4774_vm0, %v2925_v8, %v3455_v0  ;;  %v2088_v28 = vsel %vm4775_vm1, %v2927_v16, %v3455_v0  ;;  %v2101_v25 = vsel %vm1123_vm15, %v2929_v10, %v3455_v0  ;;  %vm4776_vm2 = vcmp.lt.s32.totalorder %v3925_v62, 150000  ;;  %v4788_v8 = vld [vmem:[#allocation18_spill] sm:$0xff]  ;;  %v4789_v10 = vld [vmem:[#allocation60_spill] sm:$0xff] }
  0x4d   : > { %v2114_v6 = vsel %vm4776_vm2, %v2931_v51, %v3455_v0  ;;  %vm4777_vm3 = vcmp.lt.s32.totalorder %v3935_v36, 150000  ;;  %vm4778_vm4 = vcmp.lt.s32.totalorder %v3939_v56, 150000  ;;  %v2155_v45 = vsel %vm3956_vm11, %v3455_v0, %v3846_v15  ;;  %v4785_v15 = vld [vmem:[#allocation15_spill] sm:$0xff]  ;;  %v4797_v36 = vld [vmem:[#allocation26_spill] sm:$0xff] }
  0x4e   : > { %v2127_v46 = vsel %vm4777_vm3, %v2933_v59, %v3455_v0  ;;  %v2140_v24 = vsel %vm4778_vm4, %v2935_v55, %v3455_v0  ;;  %v2177_v1 = vsel %vm3979_vm12, %v3455_v0, %v4780_v11  ;;  %v2162_v35 = vsel %vm1184_vm14, %v2155_v45, %v3455_v0  ;;  %v4790_v51 = vld [vmem:[#allocation19_spill] sm:$0xff]  ;;  %v4791_v59 = vld [vmem:[#allocation20_spill] sm:$0xff] }
  0x4f   : > { %v2184_v5 = vsel %vm1206_vm13, %v2177_v1, %v3455_v0  ;;  %v238_v56 = vstv %s3485_s19  ;;  %v250_v37 = vstv %s2945_s8  ;;  %v4187_v41 = vsub.f32 %v4784_v40, %v4021_v14  ;;  %v4794_v11 = vld [vmem:[#allocation23_spill] sm:$0xff]  ;;  %s2987_s8 = sadd.s32 22528, %s3485_s19 }
  0x50   : > { %v4191_v42 = vsub.f32 %v4785_v15, %v4026_v60  ;;  %v4195_v54 = vsub.f32 %v4786_v52, %v4034_v53  ;;  %v4199_v3 = vsub.f32 %v4787_v63, %v4039_v4  ;;  %v4203_v16 = vsub.f32 %v4788_v8, %v4044_v7  ;;  %v4792_v60 = vld [vmem:[#allocation21_spill] sm:$0xff]  ;;  %v4793_v53 = vld [vmem:[#allocation22_spill] sm:$0xff] }
  0x51   : > { %v4207_v14 = vsub.f32 %v4790_v51, %v4789_v10  ;;  %v4210_v55 = vsub.f32 %v4791_v59, %v1724_v13  ;;  %v4213_v57 = vsub.f32 %v4792_v60, %v1737_v19  ;;  %v4216_v45 = vsub.f32 %v4793_v53, %v1750_v23  ;;  %v4796_v7 = vld [vmem:[#allocation25_spill] sm:$0xff]  ;;  %v4798_v13 = vld [vmem:[#allocation27_spill] sm:$0xff]  ;;  %v4799_v19 = vld [vmem:[#allocation28_spill] sm:$0xff] }
  0x52   : > { %v4219_v4 = vsub.f32 %v4794_v11, %v1763_v50  ;;  %v4222_v1 = vsub.f32 %v4795_v12, %v1776_v26  ;;  %v4225_v62 = vsub.f32 %v4796_v7, %v1789_v31  ;;  %v4228_v40 = vsub.f32 %v4797_v36, %v1802_v33  ;;  %v4800_v23 = vld [vmem:[#allocation29_spill] sm:$0xff]  ;;  %v4801_v50 = vld [vmem:[#allocation30_spill] sm:$0xff]  ;;  %v4802_v26 = vld [vmem:[#allocation31_spill] sm:$0xff] }
  0x53   : > { %v4231_v15 = vsub.f32 %v4798_v13, %v1815_v38  ;;  %v4234_v52 = vsub.f32 %v4799_v19, %v1828_v34  ;;  %v4237_v63 = vsub.f32 %v4800_v23, %v1841_v29  ;;  %v4240_v8 = vsub.f32 %v4801_v50, %v1854_v44  ;;  %v4803_v31 = vld [vmem:[#allocation32_spill] sm:$0xff]  ;;  %v4804_v33 = vld [vmem:[#allocation33_spill] sm:$0xff]  ;;  %v4805_v38 = vld [vmem:[#allocation34_spill] sm:$0xff] }
  0x54   : > { %v4243_v10 = vsub.f32 %v4802_v26, %v1867_v47  ;;  %v4246_v51 = vsub.f32 %v4803_v31, %v1880_v21  ;;  %v4249_v59 = vsub.f32 %v4804_v33, %v1893_v20  ;;  %v4252_v60 = vsub.f32 %v4805_v38, %v1906_v17  ;;  %v4806_v34 = vld [vmem:[#allocation35_spill] sm:$0xff]  ;;  %v4807_v29 = vld [vmem:[#allocation36_spill] sm:$0xff]  ;;  %v4808_v44 = vld [vmem:[#allocation37_spill] sm:$0xff] }
  0x55   : > { %v4255_v53 = vsub.f32 %v4806_v34, %v1919_v61  ;;  %v4258_v11 = vsub.f32 %v4807_v29, %v1932_v22  ;;  %v4261_v12 = vsub.f32 %v4808_v44, %v1945_v32  ;;  %v4809_v47 = vld [vmem:[#allocation38_spill] sm:$0xff]  ;;  %v4810_v21 = vld [vmem:[#allocation39_spill] sm:$0xff]  ;;  %v4811_v20 = vld [vmem:[#allocation40_spill] sm:$0xff]  ;;  %v263_v44 = vstv %s2947_s17  ;;  %s2989_s17 = sadd.s32 23552, %s3485_s19 }
  0x56   : > { %v4264_v7 = vsub.f32 %v4809_v47, %v1958_v43  ;;  %v4267_v36 = vsub.f32 %v4810_v21, %v1971_v48  ;;  %v4271_v17 = vsub.f32 %v4811_v20, %v1984_v58  ;;  %v4812_v13 = vld [vmem:[#allocation42_spill] sm:$0xff]  ;;  %v4813_v19 = vld [vmem:[#allocation43_spill] sm:$0xff]  ;;  %v4814_v23 = vld [vmem:[#allocation44_spill] sm:$0xff] }
  0x57   : > { %v4274_v61 = vsub.f32 %v4812_v13, %v1997_v2  ;;  %v4277_v22 = vsub.f32 %v4813_v19, %v2010_v18  ;;  %v4280_v32 = vsub.f32 %v4814_v23, %v2023_v39  ;;  %v4815_v50 = vld [vmem:[#allocation45_spill] sm:$0xff]  ;;  %v4816_v26 = vld [vmem:[#allocation46_spill] sm:$0xff]  ;;  %v4817_v31 = vld [vmem:[#allocation47_spill] sm:$0xff]  ;;  %v4835_v13 = vlaneseq }
  0x58   : > { %v4283_v43 = vsub.f32 %v4815_v50, %v2036_v49  ;;  %v4286_v48 = vsub.f32 %v4816_v26, %v2049_v9  ;;  %v4289_v33 = vsub.f32 %v4817_v31, %v2062_v27  ;;  %v4819_v58 = vld [vmem:[#allocation48_spill] sm:$0xff]  ;;  %v4821_v2 = vld [vmem:[#allocation49_spill] sm:$0xff]  ;;  %v4823_v39 = vld [vmem:[#allocation50_spill] sm:$0xff]  ;;  %v289_v50 = vstv %s2951_s9  ;;  %s2993_s9 = sadd.s32 25600, %s3485_s19 }
  0x59   : > { %v4292_v38 = vsub.f32 %v4819_v58, %v2075_v30  ;;  %v4296_v18 = vsub.f32 %v4821_v2, %v2088_v28  ;;  %v4299_v34 = vsub.f32 %v4823_v39, %v2101_v25  ;;  %v4825_v49 = vld [vmem:[#allocation51_spill] sm:$0xff]  ;;  %v4827_v9 = vld [vmem:[#allocation53_spill] sm:$0xff]  ;;  %v4829_v30 = vld [vmem:[#allocation54_spill] sm:$0xff]  ;;  %v251_v19 = vadd.s32 %v250_v37, %v4835_v13 }
  0x5a   : > { %4818 = vst [vmem:[#allocation52_spill] sm:$0xff] %v4289_v33  ;;  %v4302_v29 = vsub.f32 %v4825_v49, %v2114_v6  ;;  %v4305_v27 = vsub.f32 %v4827_v9, %v2127_v46  ;;  %v4309_v47 = vsub.f32 %v4829_v30, %v2140_v24  ;;  %v4831_v21 = vld [vmem:[#allocation58_spill] sm:$0xff]  ;;  %v4833_v20 = vld [vmem:[#allocation59_spill] sm:$0xff]  ;;  %v239_v6 = vadd.s32 %v238_v56, %v4835_v13  ;;  %v2650_v58 = vld [vmem:[%s3497_s27 + $0x10] sm:$0xff] }
  0x5b   : > { %4820 = vst [vmem:[#allocation41_spill] sm:$0xff] %v4292_v38  ;;  %4822 = vst [vmem:[#allocation56_spill] sm:$0xff] %v4296_v18  ;;  %v4312_v28 = vsub.f32 %v4831_v21, %v2162_v35  ;;  %v4315_v25 = vsub.f32 %v4833_v20, %v2184_v5  ;;  %v276_v46 = vstv %s2949_s7  ;;  %v264_v23 = vadd.s32 %v263_v44, %v4835_v13  ;;  %v235_v24 = vld [vmem:[%s3497_s27] sm:$0xff]  ;;  %v2648_v35 = vld [vmem:[%s3497_s27 + $0x8] sm:$0xff]  ;;  %s2991_s7 = sadd.s32 24576, %s3485_s19 }
  0x5c   : > { %4824 = vst [vmem:[#allocation55_spill] sm:$0xff] %v4299_v34  ;;  %4826 = vst [vmem:[#allocation57_spill] sm:$0xff] %v4302_v29  ;;  %vm240_vm11 = vcmp.lt.s32.totalorder %v239_v6, 150000  ;;  %vm252_vm12 = vcmp.lt.s32.totalorder %v251_v19, 150000  ;;  %v277_v5 = vadd.s32 %v276_v46, %v4835_v13  ;;  %v1212_v56 = vld [vmem:[%s3808_s26] sm:$0xff]  ;;  %v2795_v26 = vld [vmem:[%s3808_s26 + $0x8] sm:$0xff]  ;;  %v290_v37 = vadd.s32 %v289_v50, %v4835_v13 }
  0x5d   : > { %4828 = vst [vmem:[#allocation14_spill] sm:$0xff] %v4305_v27  ;;  %4830 = vst [vmem:[#allocation15_spill] sm:$0xff] %v4309_v47  ;;  %v302_v31 = vstv %s2953_s10  ;;  %vm265_vm13 = vcmp.lt.s32.totalorder %v264_v23, 150000  ;;  %v315_v2 = vstv %s2955_s11  ;;  %v2797_v39 = vld [vmem:[%s3808_s26 + $0x10] sm:$0xff]  ;;  %v241_v49 = vsel %vm240_vm11, %v235_v24, %v3455_v0  ;;  %v2652_v21 = vld [vmem:[%s3497_s27 + $0x18] sm:$0xff]  ;;  %s2995_s10 = sadd.s32 26624, %s3485_s19 }
  0x5e   : > { %4832 = vst [vmem:[#allocation16_spill] sm:$0xff] %v4312_v28  ;;  %4834 = vst [vmem:[#allocation17_spill] sm:$0xff] %v4315_v25  ;;  %v253_v9 = vsel %vm252_vm12, %v2648_v35, %v3455_v0  ;;  %v1218_v44 = vsel %vm240_vm11, %v1212_v56, %v3455_v0  ;;  %v1230_v30 = vsel %vm252_vm12, %v2795_v26, %v3455_v0  ;;  %vm278_vm14 = vcmp.lt.s32.totalorder %v277_v5, 150000  ;;  %v2799_v46 = vld [vmem:[%s3808_s26 + $0x18] sm:$0xff]  ;;  %v2654_v24 = vld [vmem:[%s3497_s27 + $0x20] sm:$0xff]  ;;  %s2997_s11 = sadd.s32 27648, %s3485_s19 }
  0x5f   : > { %v303_v20 = vadd.s32 %v302_v31, %v4835_v13  ;;  %v328_v19 = vstv %s2957_s13  ;;  %v266_v50 = vsel %vm265_vm13, %v2650_v58, %v3455_v0  ;;  %vm291_vm15 = vcmp.lt.s32.totalorder %v290_v37, 150000  ;;  %v2801_v26 = vld [vmem:[%s3808_s26 + $0x20] sm:$0xff]  ;;  %v2803_v47 = vld [vmem:[%s3808_s26 + $0x28] sm:$0xff]  ;;  %v2660_v37 = vld [vmem:[%s3497_s27 + $0x38] sm:$0xff]  ;;  %s2999_s13 = sadd.s32 28672, %s3485_s19 }
  0x60   : > { %v316_v35 = vadd.s32 %v315_v2, %v4835_v13  ;;  %v1243_v6 = vsel %vm265_vm13, %v2797_v39, %v3455_v0  ;;  %v341_v56 = vstv %s2959_s20  ;;  %v2342_v25 = vsub.f32 %v241_v49, %v1218_v44  ;;  %v2656_v39 = vld [vmem:[%s3497_s27 + $0x28] sm:$0xff]  ;;  %v2807_v29 = vld [vmem:[%s3808_s26 + $0x38] sm:$0xff]  ;;  %s3001_s20 = sadd.s32 29696, %s3485_s19 }
  0x61   : > { %v2343_v31 = vsub.f32 %v253_v9, %v1230_v30  ;;  %v279_v28 = vsel %vm278_vm14, %v2652_v21, %v3455_v0  ;;  %v329_v58 = vadd.s32 %v328_v19, %v4835_v13  ;;  %v1256_v2 = vsel %vm278_vm14, %v2799_v46, %v3455_v0  ;;  %v2658_v30 = vld [vmem:[%s3497_s27 + $0x30] sm:$0xff] }
  0x62   : > { %v292_v23 = vsel %vm291_vm15, %v2654_v24, %v3455_v0  ;;  %vm304_vm5 = vcmp.lt.s32.totalorder %v303_v20, 150000  ;;  %v2344_v49 = vsub.f32 %v266_v50, %v1243_v6  ;;  %vm317_vm6 = vcmp.lt.s32.totalorder %v316_v35, 150000  ;;  %v2805_v19 = vld [vmem:[%s3808_s26 + $0x30] sm:$0xff] }
  0x63   : > { %v342_v9 = vadd.s32 %v341_v56, %v4835_v13  ;;  %v354_v44 = vstv %s2961_s22  ;;  %v1269_v5 = vsel %vm291_vm15, %v2801_v26, %v3455_v0  ;;  %v367_v21 = vstv %s2963_s23  ;;  %s3003_s22 = sadd.s32 30720, %s3485_s19  ;;  %s3005_s23 = sadd.s32 31744, %s3485_s19 }
  0x64   : > { %v2345_v46 = vsub.f32 %v279_v28, %v1256_v2  ;;  %v2416_v24 = vmul.f32 %v2342_v25, %v2342_v25  ;;  %v2417_v27 = vmul.f32 %v2343_v31, %v2343_v31  ;;  %v305_v50 = vsel %vm304_vm5, %v2656_v39, %v3455_v0 }
  0x65   : > { %vm330_vm7 = vcmp.lt.s32.totalorder %v329_v58, 150000  ;;  %v1282_v6 = vsel %vm304_vm5, %v2803_v47, %v3455_v0  ;;  %v355_v56 = vadd.s32 %v354_v44, %v4835_v13  ;;  %v380_v26 = vstv %s2965_s25  ;;  %v2662_v47 = vld [vmem:[%s3497_s27 + $0x40] sm:$0xff]  ;;  %s3007_s25 = sadd.s32 32768, %s3485_s19  ;;  %s2646_s19 = sshll.u32 %s4850_s14, 3 }
  0x66   : > { %v2346_v28 = vsub.f32 %v292_v23, %v1269_v5  ;;  %v2418_v25 = vmul.f32 %v2344_v49, %v2344_v49  ;;  %v318_v31 = vsel %vm317_vm6, %v2658_v30, %v3455_v0  ;;  %vm343_vm8 = vcmp.lt.s32.totalorder %v342_v9, 150000  ;;  %v2809_v44 = vld [vmem:[%s3808_s26 + $0x40] sm:$0xff] }
  0x67   : > { %v368_v2 = vadd.s32 %v367_v21, %v4835_v13  ;;  %v1295_v20 = vsel %vm317_vm6, %v2805_v19, %v3455_v0  ;;  %v393_v39 = vstv %s2967_s18  ;;  %v2347_v34 = vsub.f32 %v305_v50, %v1282_v6  ;;  %v2664_v21 = vld [vmem:[%s3497_s27 + $0x48] sm:$0xff]  ;;  %v2813_v6 = vld [vmem:[%s3808_s26 + $0x50] sm:$0xff]  ;;  %s234_s18 = scalar_lea.vmem %s4667_s3, %s2646_s19 }
  0x68   : > { %v2419_v18 = vmul.f32 %v2345_v46, %v2345_v46  ;;  %v2491_v23 = vadd.f32 %v2417_v27, %v2416_v24  ;;  %v331_v49 = vsel %vm330_vm7, %v2660_v37, %v3455_v0  ;;  %v381_v5 = vadd.s32 %v380_v26, %v4835_v13  ;;  %v2811_v19 = vld [vmem:[%s3808_s26 + $0x48] sm:$0xff] }
  0x69   : > { %v406_v30 = vstv %s2969_s21  ;;  %v1308_v35 = vsel %vm330_vm7, %v2807_v29, %v3455_v0  ;;  %vm356_vm9 = vcmp.lt.s32.totalorder %v355_v56, 150000  ;;  %v2348_v38 = vsub.f32 %v318_v31, %v1295_v20  ;;  %v2666_v29 = vld [vmem:[%s3497_s27 + $0x50] sm:$0xff]  ;;  %v2668_v20 = vld [vmem:[%s3497_s27 + $0x58] sm:$0xff] }
  0x6a   : > { %v2420_v33 = vmul.f32 %v2346_v28, %v2346_v28  ;;  %v2492_v50 = vadd.f32 %v2491_v23, %v2418_v25  ;;  %v344_v27 = vsel %vm343_vm8, %v2662_v47, %v3455_v0  ;;  %v394_v46 = vadd.s32 %v393_v39, %v4835_v13  ;;  %v2815_v39 = vld [vmem:[%s3808_s26 + $0x58] sm:$0xff] }
  0x6b   : > { %v419_v24 = vstv %s2971_s28  ;;  %v1321_v58 = vsel %vm343_vm8, %v2809_v44, %v3455_v0  ;;  %vm369_vm10 = vcmp.lt.s32.totalorder %v368_v2, 150000  ;;  %v2349_v37 = vsub.f32 %v331_v49, %v1308_v35 }
  0x6c   : > { %v2421_v26 = vmul.f32 %v2347_v34, %v2347_v34  ;;  %v2493_v28 = vadd.f32 %v2492_v50, %v2419_v18  ;;  %v357_v25 = vsel %vm356_vm9, %v2664_v21, %v3455_v0  ;;  %vm382_vm0 = vcmp.lt.s32.totalorder %v381_v5, 150000  ;;  %v2817_v21 = vld [vmem:[%s3808_s26 + $0x60] sm:$0xff] }
  0x6d   : > { %v407_v31 = vadd.s32 %v406_v30, %v4835_v13  ;;  %v1334_v9 = vsel %vm356_vm9, %v2811_v19, %v3455_v0  ;;  %v432_v47 = vstv %s2973_s12  ;;  %v2350_v44 = vsub.f32 %v344_v27, %v1321_v58  ;;  %v2670_v30 = vld [vmem:[%s3497_s27 + $0x60] sm:$0xff] }
  0x6e   : > { %v2422_v23 = vmul.f32 %v2348_v38, %v2348_v38  ;;  %v2494_v34 = vadd.f32 %v2493_v28, %v2420_v33  ;;  %v370_v18 = vsel %vm369_vm10, %v2666_v29, %v3455_v0  ;;  %vm395_vm1 = vcmp.lt.s32.totalorder %v394_v46, 150000  ;;  %v2819_v29 = vld [vmem:[%s3808_s26 + $0x68] sm:$0xff] }
  0x6f   : > { %v420_v49 = vadd.s32 %v419_v24, %v4835_v13  ;;  %v1347_v56 = vsel %vm369_vm10, %v2813_v6, %v3455_v0  ;;  %v445_v35 = vstv %s2975_s24  ;;  %v2351_v19 = vsub.f32 %v357_v25, %v1334_v9  ;;  %v2672_v24 = vld [vmem:[%s3497_s27 + $0x68] sm:$0xff]  ;;  %v2674_v9 = vld [vmem:[%s3497_s27 + $0x70] sm:$0xff] }
  0x70   : > { %v2423_v50 = vmul.f32 %v2349_v37, %v2349_v37  ;;  %v2495_v38 = vadd.f32 %v2494_v34, %v2421_v26  ;;  %v383_v33 = vsel %vm382_vm0, %v2668_v20, %v3455_v0  ;;  %vm408_vm2 = vcmp.lt.s32.totalorder %v407_v31, 150000 }
  0x71   : > { %v433_v27 = vadd.s32 %v432_v47, %v4835_v13  ;;  %v1360_v2 = vsel %vm382_vm0, %v2815_v39, %v3455_v0  ;;  %v458_v58 = vstv %s2977_s29  ;;  %v2352_v6 = vsub.f32 %v370_v18, %v1347_v56  ;;  %v2821_v47 = vld [vmem:[%s3808_s26 + $0x70] sm:$0xff]  ;;  %v2676_v56 = vld [vmem:[%s3497_s27 + $0x78] sm:$0xff] }
  0x72   : > { %v2424_v28 = vmul.f32 %v2350_v44, %v2350_v44  ;;  %v2496_v37 = vadd.f32 %v2495_v38, %v2422_v23  ;;  %v396_v26 = vsel %vm395_vm1, %v2670_v30, %v3455_v0  ;;  %vm421_vm3 = vcmp.lt.s32.totalorder %v420_v49, 150000 }
  0x73   : > { %v446_v25 = vadd.s32 %v445_v35, %v4835_v13  ;;  %v1373_v5 = vsel %vm395_vm1, %v2817_v21, %v3455_v0  ;;  %v471_v20 = vstv %s2979_s30  ;;  %v2353_v39 = vsub.f32 %v383_v33, %v1360_v2  ;;  %v2823_v35 = vld [vmem:[%s3808_s26 + $0x78] sm:$0xff]  ;;  %v2678_v2 = vld [vmem:[%s3497_s27 + $0x80] sm:$0xff] }
  0x74   : > { %v2425_v34 = vmul.f32 %v2351_v19, %v2351_v19  ;;  %v2497_v44 = vadd.f32 %v2496_v37, %v2423_v50  ;;  %v409_v23 = vsel %vm408_vm2, %v2672_v24, %v3455_v0  ;;  %vm434_vm4 = vcmp.lt.s32.totalorder %v433_v27, 150000 }
  0x75   : > { %v459_v18 = vadd.s32 %v458_v58, %v4835_v13  ;;  %v1386_v46 = vsel %vm408_vm2, %v2819_v29, %v3455_v0  ;;  %v484_v30 = vstv %s2981_s4  ;;  %v2354_v21 = vsub.f32 %v396_v26, %v1373_v5  ;;  %v2825_v58 = vld [vmem:[%s3808_s26 + $0x80] sm:$0xff]  ;;  %v2680_v5 = vld [vmem:[%s3497_s27 + $0x88] sm:$0xff] }
  0x76   : > { %v2426_v38 = vmul.f32 %v2352_v6, %v2352_v6  ;;  %v2498_v19 = vadd.f32 %v2497_v44, %v2424_v28  ;;  %v422_v50 = vsel %vm421_vm3, %v2674_v9, %v3455_v0  ;;  %vm447_vm11 = vcmp.lt.s32.totalorder %v446_v25, 150000 }
  0x77   : > { %v472_v33 = vadd.s32 %v471_v20, %v4835_v13  ;;  %v1399_v31 = vsel %vm421_vm3, %v2821_v47, %v3455_v0  ;;  %v497_v24 = vstv %s2983_s5  ;;  %v2355_v29 = vsub.f32 %v409_v23, %v1386_v46  ;;  %v2827_v20 = vld [vmem:[%s3808_s26 + $0x88] sm:$0xff]  ;;  %v2682_v46 = vld [vmem:[%s3497_s27 + $0x90] sm:$0xff] }
  0x78   : > { %v2427_v37 = vmul.f32 %v2353_v39, %v2353_v39  ;;  %v2499_v6 = vadd.f32 %v2498_v19, %v2425_v34  ;;  %v435_v28 = vsel %vm434_vm4, %v2676_v56, %v3455_v0  ;;  %vm460_vm12 = vcmp.lt.s32.totalorder %v459_v18, 150000 }
  0x79   : > { %v485_v26 = vadd.s32 %v484_v30, %v4835_v13  ;;  %v1412_v49 = vsel %vm434_vm4, %v2823_v35, %v3455_v0  ;;  %v510_v9 = vstv %s2985_s6  ;;  %v2356_v47 = vsub.f32 %v422_v50, %v1399_v31  ;;  %v2829_v30 = vld [vmem:[%s3808_s26 + $0x90] sm:$0xff]  ;;  %v2684_v31 = vld [vmem:[%s3497_s27 + $0x98] sm:$0xff] }
  0x7a   : > { %v2428_v44 = vmul.f32 %v2354_v21, %v2354_v21  ;;  %v2500_v39 = vadd.f32 %v2499_v6, %v2426_v38  ;;  %v448_v34 = vsel %vm447_vm11, %v2678_v2, %v3455_v0  ;;  %vm473_vm13 = vcmp.lt.s32.totalorder %v472_v33, 150000 }
  0x7b   : > { %v498_v23 = vadd.s32 %v497_v24, %v4835_v13  ;;  %v1425_v27 = vsel %vm447_vm11, %v2825_v58, %v3455_v0  ;;  %v523_v56 = vstv %s2987_s8  ;;  %v2357_v35 = vsub.f32 %v435_v28, %v1412_v49  ;;  %v2831_v24 = vld [vmem:[%s3808_s26 + $0x98] sm:$0xff]  ;;  %v2686_v49 = vld [vmem:[%s3497_s27 + $0xa0] sm:$0xff] }
  0x7c   : > { %v2429_v19 = vmul.f32 %v2355_v29, %v2355_v29  ;;  %v2501_v21 = vadd.f32 %v2500_v39, %v2427_v37  ;;  %v461_v38 = vsel %vm460_vm12, %v2680_v5, %v3455_v0  ;;  %vm486_vm14 = vcmp.lt.s32.totalorder %v485_v26, 150000 }
  0x7d   : > { %v511_v50 = vadd.s32 %v510_v9, %v4835_v13  ;;  %v1438_v25 = vsel %vm460_vm12, %v2827_v20, %v3455_v0  ;;  %v536_v2 = vstv %s2989_s17  ;;  %v2358_v58 = vsub.f32 %v448_v34, %v1425_v27  ;;  %v2833_v9 = vld [vmem:[%s3808_s26 + $0xa0] sm:$0xff]  ;;  %v2688_v27 = vld [vmem:[%s3497_s27 + $0xa8] sm:$0xff] }
  0x7e   : > { %v2430_v6 = vmul.f32 %v2356_v47, %v2356_v47  ;;  %v2502_v29 = vadd.f32 %v2501_v21, %v2428_v44  ;;  %v474_v37 = vsel %vm473_vm13, %v2682_v46, %v3455_v0  ;;  %vm499_vm15 = vcmp.lt.s32.totalorder %v498_v23, 150000 }
  0x7f   : > { %v524_v28 = vadd.s32 %v523_v56, %v4835_v13  ;;  %v1451_v18 = vsel %vm473_vm13, %v2829_v30, %v3455_v0  ;;  %v549_v5 = vstv %s2991_s7  ;;  %v2359_v20 = vsub.f32 %v461_v38, %v1438_v25  ;;  %v2835_v56 = vld [vmem:[%s3808_s26 + $0xa8] sm:$0xff]  ;;  %v2690_v25 = vld [vmem:[%s3497_s27 + $0xb0] sm:$0xff] }
  0x80   : > { %v2431_v39 = vmul.f32 %v2357_v35, %v2357_v35  ;;  %v2503_v47 = vadd.f32 %v2502_v29, %v2429_v19  ;;  %v487_v44 = vsel %vm486_vm14, %v2684_v31, %v3455_v0  ;;  %vm512_vm5 = vcmp.lt.s32.totalorder %v511_v50, 150000 }
  0x81   : > { %v537_v34 = vadd.s32 %v536_v2, %v4835_v13  ;;  %v1464_v33 = vsel %vm486_vm14, %v2831_v24, %v3455_v0  ;;  %v562_v46 = vstv %s2993_s9  ;;  %v2360_v30 = vsub.f32 %v474_v37, %v1451_v18  ;;  %v2837_v2 = vld [vmem:[%s3808_s26 + $0xb0] sm:$0xff]  ;;  %v2692_v18 = vld [vmem:[%s3497_s27 + $0xb8] sm:$0xff] }
  0x82   : > { %v2432_v21 = vmul.f32 %v2358_v58, %v2358_v58  ;;  %v2504_v35 = vadd.f32 %v2503_v47, %v2430_v6  ;;  %v500_v19 = vsel %vm499_vm15, %v2686_v49, %v3455_v0  ;;  %vm525_vm6 = vcmp.lt.s32.totalorder %v524_v28, 150000 }
  0x83   : > { %v550_v38 = vadd.s32 %v549_v5, %v4835_v13  ;;  %v1477_v26 = vsel %vm499_vm15, %v2833_v9, %v3455_v0  ;;  %v575_v31 = vstv %s2995_s10  ;;  %v2361_v24 = vsub.f32 %v487_v44, %v1464_v33  ;;  %v2839_v5 = vld [vmem:[%s3808_s26 + $0xb8] sm:$0xff]  ;;  %v2694_v33 = vld [vmem:[%s3497_s27 + $0xc0] sm:$0xff] }
  0x84   : > { %v2433_v29 = vmul.f32 %v2359_v20, %v2359_v20  ;;  %v2505_v58 = vadd.f32 %v2504_v35, %v2431_v39  ;;  %v513_v6 = vsel %vm512_vm5, %v2688_v27, %v3455_v0  ;;  %vm538_vm7 = vcmp.lt.s32.totalorder %v537_v34, 150000 }
  0x85   : > { %v563_v37 = vadd.s32 %v562_v46, %v4835_v13  ;;  %v1490_v23 = vsel %vm512_vm5, %v2835_v56, %v3455_v0  ;;  %v588_v49 = vstv %s2997_s11  ;;  %v2362_v9 = vsub.f32 %v500_v19, %v1477_v26  ;;  %v2841_v46 = vld [vmem:[%s3808_s26 + $0xc0] sm:$0xff]  ;;  %v2696_v26 = vld [vmem:[%s3497_s27 + $0xc8] sm:$0xff] }
  0x86   : > { %v2434_v47 = vmul.f32 %v2360_v30, %v2360_v30  ;;  %v2506_v20 = vadd.f32 %v2505_v58, %v2432_v21  ;;  %v526_v39 = vsel %vm525_vm6, %v2690_v25, %v3455_v0  ;;  %vm551_vm8 = vcmp.lt.s32.totalorder %v550_v38, 150000 }
  0x87   : > { %v576_v44 = vadd.s32 %v575_v31, %v4835_v13  ;;  %v1503_v50 = vsel %vm525_vm6, %v2837_v2, %v3455_v0  ;;  %v601_v27 = vstv %s2999_s13  ;;  %v2363_v56 = vsub.f32 %v513_v6, %v1490_v23  ;;  %v2843_v31 = vld [vmem:[%s3808_s26 + $0xc8] sm:$0xff]  ;;  %v2698_v23 = vld [vmem:[%s3497_s27 + $0xd0] sm:$0xff] }
  0x88   : > { %v2435_v35 = vmul.f32 %v2361_v24, %v2361_v24  ;;  %v2507_v30 = vadd.f32 %v2506_v20, %v2433_v29  ;;  %v539_v21 = vsel %vm538_vm7, %v2692_v18, %v3455_v0  ;;  %vm564_vm9 = vcmp.lt.s32.totalorder %v563_v37, 150000  ;;  %v2849_v37 = vld [vmem:[%s3808_s26 + $0xe0] sm:$0xff] }
  0x89   : > { %v589_v19 = vadd.s32 %v588_v49, %v4835_v13  ;;  %v1516_v28 = vsel %vm538_vm7, %v2839_v5, %v3455_v0  ;;  %v614_v25 = vstv %s3001_s20  ;;  %v2364_v2 = vsub.f32 %v526_v39, %v1503_v50  ;;  %v2845_v49 = vld [vmem:[%s3808_s26 + $0xd0] sm:$0xff] }
  0x8a   : > { %v2436_v58 = vmul.f32 %v2362_v9, %v2362_v9  ;;  %v2508_v24 = vadd.f32 %v2507_v30, %v2434_v47  ;;  %v552_v29 = vsel %vm551_vm8, %v2694_v33, %v3455_v0  ;;  %vm577_vm10 = vcmp.lt.s32.totalorder %v576_v44, 150000  ;;  %v2700_v33 = vld [vmem:[%s3497_s27 + $0xd8] sm:$0xff]  ;;  %v2851_v44 = vld [vmem:[%s3808_s26 + $0xe8] sm:$0xff] }
  0x8b   : > { %v602_v6 = vadd.s32 %v601_v27, %v4835_v13  ;;  %v1529_v34 = vsel %vm551_vm8, %v2841_v46, %v3455_v0  ;;  %v627_v18 = vstv %s3003_s22  ;;  %v2365_v5 = vsub.f32 %v539_v21, %v1516_v28  ;;  %v2847_v27 = vld [vmem:[%s3808_s26 + $0xd8] sm:$0xff] }
  0x8c   : > { %v2437_v20 = vmul.f32 %v2363_v56, %v2363_v56  ;;  %v2509_v9 = vadd.f32 %v2508_v24, %v2435_v35  ;;  %v565_v47 = vsel %vm564_vm9, %v2696_v26, %v3455_v0  ;;  %vm590_vm0 = vcmp.lt.s32.totalorder %v589_v19, 150000  ;;  %v2702_v26 = vld [vmem:[%s3497_s27 + $0xe0] sm:$0xff] }
  0x8d   : > { %v615_v39 = vadd.s32 %v614_v25, %v4835_v13  ;;  %v1542_v50 = vsel %vm564_vm9, %v2843_v31, %v3455_v0  ;;  %v640_v38 = vstv %s3005_s23  ;;  %v2366_v46 = vsub.f32 %v552_v29, %v1529_v34 }
  0x8e   : > { %v2438_v30 = vmul.f32 %v2364_v2, %v2364_v2  ;;  %v2510_v56 = vadd.f32 %v2509_v9, %v2436_v58  ;;  %v578_v35 = vsel %vm577_vm10, %v2698_v23, %v3455_v0  ;;  %v628_v21 = vadd.s32 %v627_v18, %v4835_v13  ;;  %v2704_v23 = vld [vmem:[%s3497_s27 + $0xe8] sm:$0xff] }
  0x8f   : > { %v1555_v28 = vsel %vm577_vm10, %v2845_v49, %v3455_v0  ;;  %vm603_vm1 = vcmp.lt.s32.totalorder %v602_v6, 150000  ;;  %v2367_v25 = vsub.f32 %v565_v47, %v1542_v50  ;;  %v2439_v31 = vmul.f32 %v2365_v5, %v2365_v5  ;;  %v2706_v47 = vld [vmem:[%s3497_s27 + $0xf0] sm:$0xff] }
  0x90   : > { %v2511_v24 = vadd.f32 %v2510_v56, %v2437_v20  ;;  %v591_v2 = vsel %vm590_vm0, %v2700_v33, %v3455_v0  ;;  %v641_v58 = vadd.s32 %v640_v38, %v4835_v13  ;;  %v653_v29 = vstv %s3007_s25  ;;  %v2853_v50 = vld [vmem:[%s3808_s26 + $0xf0] sm:$0xff]  ;;  %v2855_v56 = vld [vmem:[%s3808_s26 + $0xf8] sm:$0xff] }
  0x91   : > { %v1568_v34 = vsel %vm590_vm0, %v2847_v27, %v3455_v0  ;;  %vm616_vm2 = vcmp.lt.s32.totalorder %v615_v39, 150000  ;;  %v2368_v18 = vsub.f32 %v578_v35, %v1555_v28  ;;  %v2440_v49 = vmul.f32 %v2366_v46, %v2366_v46 }
  0x92   : > { %v2512_v9 = vadd.f32 %v2511_v24, %v2438_v30  ;;  %v604_v5 = vsel %vm603_vm1, %v2702_v26, %v3455_v0  ;;  %vm629_vm3 = vcmp.lt.s32.totalorder %v628_v21, 150000  ;;  %v1581_v20 = vsel %vm603_vm1, %v2849_v37, %v3455_v0  ;;  %v2708_v30 = vld [vmem:[%s3497_s27 + $0xf8] sm:$0xff]  ;;  %v2710_v37 = vld [vmem:[%s3497_s27 + $0x100] sm:$0xff] }
  0x93   : > { %v654_v19 = vadd.s32 %v653_v29, %v4835_v13  ;;  %v2369_v39 = vsub.f32 %v591_v2, %v1568_v34  ;;  %v2441_v33 = vmul.f32 %v2367_v25, %v2367_v25  ;;  %v617_v27 = vsel %vm616_vm2, %v2704_v23, %v3455_v0  ;;  %v2857_v25 = vld [vmem:[%s3808_s26 + $0x100] sm:$0xff] }
  0x94   : > { %v2513_v38 = vadd.f32 %v2512_v9, %v2439_v31  ;;  %v1594_v46 = vsel %vm616_vm2, %v2851_v44, %v3455_v0  ;;  %vm642_vm4 = vcmp.lt.s32.totalorder %v641_v58, 150000  ;;  %v2370_v35 = vsub.f32 %v604_v5, %v1581_v20 }
  0x95   : > { %v2442_v28 = vmul.f32 %v2368_v18, %v2368_v18  ;;  %v630_v26 = vsel %vm629_vm3, %v2706_v47, %v3455_v0  ;;  %v1607_v13 = vsel %vm629_vm3, %v2853_v50, %v3455_v0  ;;  %vm655_vm11 = vcmp.lt.s32.totalorder %v654_v19, 150000 }
  0x96   : > { %v2514_v6 = vadd.f32 %v2513_v38, %v2440_v49  ;;  %v2371_v31 = vsub.f32 %v617_v27, %v1594_v46  ;;  %v2443_v24 = vmul.f32 %v2369_v39, %v2369_v39  ;;  %v643_v29 = vsel %vm642_vm4, %v2708_v30, %v3455_v0 }
  0x97   : > { %v1620_v58 = vsel %vm642_vm4, %v2855_v56, %v3455_v0  ;;  %v2372_v34 = vsub.f32 %v630_v26, %v1607_v13  ;;  %v2444_v23 = vmul.f32 %v2370_v35, %v2370_v35  ;;  %v656_v18 = vsel %vm655_vm11, %v2710_v37, %v3455_v0 }
  0x98   : > { %v2515_v2 = vadd.f32 %v2514_v6, %v2441_v33  ;;  %v1633_v49 = vsel %vm655_vm11, %v2857_v25, %v3455_v0  ;;  %v2373_v9 = vsub.f32 %v643_v29, %v1620_v58  ;;  %v2445_v21 = vmul.f32 %v2371_v31, %v2371_v31 }
  0x99   : > { %v2374_v20 = vsub.f32 %v656_v18, %v1633_v49  ;;  %v2446_v47 = vmul.f32 %v2372_v34, %v2372_v34  ;;  %v2449_v27 = vmul.f32 %v4187_v41, %v4187_v41  ;;  %v2450_v30 = vmul.f32 %v4191_v42, %v4191_v42 }
  0x9a   : > { %v2516_v44 = vadd.f32 %v2515_v2, %v2442_v28  ;;  %v2447_v50 = vmul.f32 %v2373_v9, %v2373_v9  ;;  %v2451_v35 = vmul.f32 %v4195_v54, %v4195_v54  ;;  %v2452_v6 = vmul.f32 %v4199_v3, %v4199_v3 }
  0x9b   : > { %v2448_v33 = vmul.f32 %v2374_v20, %v2374_v20  ;;  %v2453_v13 = vmul.f32 %v4203_v16, %v4203_v16  ;;  %v2454_v41 = vmul.f32 %v4207_v14, %v4207_v14  ;;  %v2455_v42 = vmul.f32 %v4210_v55, %v4210_v55 }
  0x9c   : > { %v2517_v5 = vadd.f32 %v2516_v44, %v2443_v24  ;;  %v2456_v54 = vmul.f32 %v4213_v57, %v4213_v57  ;;  %v2457_v3 = vmul.f32 %v4216_v45, %v4216_v45  ;;  %v2458_v16 = vmul.f32 %v4219_v4, %v4219_v4 }
  0x9d   : > { %v2459_v14 = vmul.f32 %v4222_v1, %v4222_v1  ;;  %v2460_v55 = vmul.f32 %v4225_v62, %v4225_v62  ;;  %v2461_v57 = vmul.f32 %v4228_v40, %v4228_v40  ;;  %v2462_v45 = vmul.f32 %v4231_v15, %v4231_v15 }
  0x9e   : > { %v2518_v19 = vadd.f32 %v2517_v5, %v2444_v23  ;;  %v2463_v4 = vmul.f32 %v4234_v52, %v4234_v52  ;;  %v2464_v1 = vmul.f32 %v4237_v63, %v4237_v63  ;;  %v2465_v62 = vmul.f32 %v4240_v8, %v4240_v8 }
  0x9f   : > { %v2466_v40 = vmul.f32 %v4243_v10, %v4243_v10  ;;  %v2467_v15 = vmul.f32 %v4246_v51, %v4246_v51  ;;  %v2468_v52 = vmul.f32 %v4249_v59, %v4249_v59  ;;  %v2469_v63 = vmul.f32 %v4252_v60, %v4252_v60 }
  0xa0   : > { %v2519_v39 = vadd.f32 %v2518_v19, %v2445_v21  ;;  %v2470_v8 = vmul.f32 %v4255_v53, %v4255_v53  ;;  %v2471_v10 = vmul.f32 %v4258_v11, %v4258_v11  ;;  %v2472_v51 = vmul.f32 %v4261_v12, %v4261_v12 }
  0xa1   : > { %v2473_v59 = vmul.f32 %v4264_v7, %v4264_v7  ;;  %v2474_v60 = vmul.f32 %v4267_v36, %v4267_v36  ;;  %v2475_v53 = vmul.f32 %v4271_v17, %v4271_v17  ;;  %v2476_v11 = vmul.f32 %v4274_v61, %v4274_v61 }
  0xa2   : > { %v2520_v38 = vadd.f32 %v2519_v39, %v2446_v47  ;;  %v2477_v12 = vmul.f32 %v4277_v22, %v4277_v22  ;;  %v2478_v7 = vmul.f32 %v4280_v32, %v4280_v32  ;;  %v2479_v36 = vmul.f32 %v4283_v43, %v4283_v43  ;;  %v4837_v22 = vld [vmem:[#allocation41_spill] sm:$0xff]  ;;  %v4838_v32 = vld [vmem:[#allocation56_spill] sm:$0xff] }
  0xa3   : > { %v2480_v17 = vmul.f32 %v4286_v48, %v4286_v48 }
  0xa4   : > { %v2521_v46 = vadd.f32 %v2520_v38, %v2447_v50 }
  0xa6   : > { %v2522_v56 = vadd.f32 %v2521_v46, %v2448_v33 }
  0xa8   : > { %v2523_v28 = vadd.f32 %v2522_v56, %v2449_v27 }
  0xaa   : > { %v2524_v26 = vadd.f32 %v2523_v28, %v2450_v30 }
  0xac   : > { %v2525_v37 = vadd.f32 %v2524_v26, %v2451_v35 }
  0xae   : > { %v2526_v25 = vadd.f32 %v2525_v37, %v2452_v6  ;;  %v4836_v6 = vld [vmem:[#allocation52_spill] sm:$0xff] }
  0xaf   : > { %v2481_v61 = vmul.f32 %v4836_v6, %v4836_v6 }
  0xb0   : > { %v2527_v31 = vadd.f32 %v2526_v25, %v2453_v13  ;;  %v2482_v13 = vmul.f32 %v4837_v22, %v4837_v22 }
  0xb2   : > { %v2528_v24 = vadd.f32 %v2527_v31, %v2454_v41  ;;  %v2483_v41 = vmul.f32 %v4838_v32, %v4838_v32 }
  0xb4   : > { %v2529_v2 = vadd.f32 %v2528_v24, %v2455_v42  ;;  %v4839_v42 = vld [vmem:[#allocation55_spill] sm:$0xff] }
  0xb5   : > { %v2484_v43 = vmul.f32 %v4839_v42, %v4839_v42 }
  0xb6   : > { %v2530_v29 = vadd.f32 %v2529_v2, %v2456_v54  ;;  %v4840_v54 = vld [vmem:[#allocation57_spill] sm:$0xff] }
  0xb7   : > { %v2485_v48 = vmul.f32 %v4840_v54, %v4840_v54 }
  0xb8   : > { %v2531_v58 = vadd.f32 %v2530_v29, %v2457_v3  ;;  %v4841_v3 = vld [vmem:[#allocation14_spill] sm:$0xff]  ;;  %v4842_v29 = vld [vmem:[#allocation15_spill] sm:$0xff] }
  0xb9   : > { %v2486_v2 = vmul.f32 %v4841_v3, %v4841_v3 }
  0xba   : > { %v2532_v34 = vadd.f32 %v2531_v58, %v2458_v16 }
  0xbc   : > { %v2533_v23 = vadd.f32 %v2532_v34, %v2459_v14  ;;  %v2487_v14 = vmul.f32 %v4842_v29, %v4842_v29 }
  0xbe   : > { %v2534_v44 = vadd.f32 %v2533_v23, %v2460_v55  ;;  %v4843_v55 = vld [vmem:[#allocation16_spill] sm:$0xff]  ;;  %v4844_v23 = vld [vmem:[#allocation17_spill] sm:$0xff] }
  0xbf   : > { %v2488_v34 = vmul.f32 %v4843_v55, %v4843_v55 }
  0xc0   : > { %v2535_v18 = vadd.f32 %v2534_v44, %v2461_v57 }
  0xc2   : > { %v2536_v49 = vadd.f32 %v2535_v18, %v2462_v45  ;;  %v2489_v45 = vmul.f32 %v4844_v23, %v4844_v23 }
  0xc4   : > { %v2537_v9 = vadd.f32 %v2536_v49, %v2463_v4 }
  0xc6   : > { %v2538_v21 = vadd.f32 %v2537_v9, %v2464_v1 }
  0xc8   : > { %v2539_v5 = vadd.f32 %v2538_v21, %v2465_v62 }
  0xca   : > { %v2540_v20 = vadd.f32 %v2539_v5, %v2466_v40 }
  0xcc   : > { %v2541_v47 = vadd.f32 %v2540_v20, %v2467_v15 }
  0xce   : > { %v2542_v19 = vadd.f32 %v2541_v47, %v2468_v52 }
  0xd0   : > { %v2543_v50 = vadd.f32 %v2542_v19, %v2469_v63 }
  0xd2   : > { %v2544_v39 = vadd.f32 %v2543_v50, %v2470_v8 }
  0xd4   : > { %v2545_v33 = vadd.f32 %v2544_v39, %v2471_v10 }
  0xd6   : > { %v2546_v38 = vadd.f32 %v2545_v33, %v2472_v51 }
  0xd8   : > { %v2547_v27 = vadd.f32 %v2546_v38, %v2473_v59 }
  0xda   : > { %v2548_v46 = vadd.f32 %v2547_v27, %v2474_v60 }
  0xdc   : > { %v2549_v30 = vadd.f32 %v2548_v46, %v2475_v53 }
  0xde   : > { %v2550_v56 = vadd.f32 %v2549_v30, %v2476_v11 }
  0xe0   : > { %v2551_v35 = vadd.f32 %v2550_v56, %v2477_v12 }
  0xe2   : > { %v2552_v28 = vadd.f32 %v2551_v35, %v2478_v7 }
  0xe4   : > { %v2553_v26 = vadd.f32 %v2552_v28, %v2479_v36 }
  0xe6   : > { %v2554_v37 = vadd.f32 %v2553_v26, %v2480_v17 }
  0xe8   : > { %v2555_v25 = vadd.f32 %v2554_v37, %v2481_v61 }
  0xea   : > { %v2556_v31 = vadd.f32 %v2555_v25, %v2482_v13 }
  0xec   : > { %v2557_v24 = vadd.f32 %v2556_v31, %v2483_v41 }
  0xee   : > { %v2558_v16 = vadd.f32 %v2557_v24, %v2484_v43 }
  0xf0   : > { %v2559_v58 = vadd.f32 %v2558_v16, %v2485_v48 }
  0xf2   : > { %v2560_v57 = vadd.f32 %v2559_v58, %v2486_v2 }
  0xf4   : > { %v2561_v44 = vadd.f32 %v2560_v57, %v2487_v14 }
  0xf6   : > { %v2562_v4 = vadd.f32 %v2561_v44, %v2488_v34 }
  0xf8   : > { %v2563_v18 = vadd.f32 %v2562_v4, %v2489_v45 }
  0xfa   : > { %2565 = vst [vmem:[%s234_s18] sm:$0xff] %v2563_v18 }
  0xfb PF: > { %s15_s16 = sadd.s32 1, %s3430_s16   ;;  %s4845_s14 = smov %s3426_s15 }
  0xfc   : > { %p12_p8 = scmp.ge.s32.totalorder %s15_s16, 4   ;;  %s4846_s15 = smov %s4848_s1 }
  0xfe   :  { %14 = sbr.rel (!%p12_p8) target bundleno = 2 (0x2), region = 357 }

</bundles_post_ra>
